<compile_context>
chip_gen: v7x
topology: tpu7x:2x2x1
jax: 0.10.0
libtpu: 0.0.40
codegen_flags: <defaults>
</compile_context>

<pallas_src>
import jax
import jax.numpy as jnp
import numpy as np
from jax import lax
from jax.experimental import pallas as pl
from jax.experimental.pallas import tpu as pltpu

# The pure-JAX reference uses full f32 matmuls so it matches the kernel's
# HIGHEST-precision MXU dots.
jax.config.update("jax_default_matmul_precision", "highest")

NF = 6          # number of mixed functions in MixFun
H = 4           # hidden width (MixFun output neurons)
_HIGH = lax.Precision.HIGHEST

_FUNCS = (
    lambda v: v,                 # identity
    jnp.sin,
    jnp.cos,
    jnp.tanh,
    lambda v: jnp.exp(-v * v),   # gaussian
    jnp.exp,
)


# ----------------------------------------------------------------------------
# Fused kernel (batch on lanes; feature rows on sublanes; MXU for all affines)
# ----------------------------------------------------------------------------
def mixfunn_kernel(x_ref, w1_ref, w2_ref, p_ref, w3_ref, o_ref):
    f32 = jnp.float32
    x = x_ref[...]            # (2, TB)   batch on lanes
    w1 = w1_ref[...]          # (8, 8)    Quad(2,4)  cols [x0,x1,x00,x01,x11,b,0,0]
    w2 = w2_ref[...]          # (24, 16)  MixFun proj cols [y1(4),pairs(10),b,0]
    pmat = p_ref[...]         # (8, 24)   block-diag softmax(alpha) mixing matrix
    w3 = w3_ref[...]          # (8, 16)   Quad(4,1)  row 0 = [y2(4),pairs(10),b,0]

    tb = x.shape[1]
    ones = jnp.ones((1, tb), f32)
    zero = jnp.zeros((1, tb), f32)

    def pair_rows(rows):
        """Upper-triangular (incl. diagonal) pairwise products of (1, TB) rows."""
        n = len(rows)
        return [rows[i] * rows[j] for i in range(n) for j in range(i, n)]

    def mm(w, f):
        return jnp.dot(w, f, preferred_element_type=f32, precision=_HIGH)

    # ---- Quad(2, 4): one (8,8)x(8,TB) MXU matmul (bias via ones row) -------
    x_rows = [x[0:1, :], x[1:2, :]]
    feat1 = jnp.concatenate(x_rows + pair_rows(x_rows) + [ones, zero, zero],
                            axis=0)                       # (8, TB)
    y1 = mm(w1, feat1)                                    # (8, TB); rows 4..7 zero

    # ---- MixFun(4, 4, second_order_function=True) ---------------------------
    y1_rows = [y1[i:i + 1, :] for i in range(H)]
    feat2 = jnp.concatenate([y1[0:H, :]] + pair_rows(y1_rows) + [ones, zero],
                            axis=0)                       # (16, TB)
    z = mm(w2, feat2)                                     # (24, TB), function-major

    fz = jnp.concatenate([
        z[0 * H:1 * H, :],                                # identity
        jnp.sin(z[1 * H:2 * H, :]),
        jnp.cos(z[2 * H:3 * H, :]),
        jnp.tanh(z[3 * H:4 * H, :]),
        jnp.exp(-(z[4 * H:5 * H, :] * z[4 * H:5 * H, :])),
        jnp.exp(z[5 * H:6 * H, :]),
    ], axis=0)                                            # (24, TB)
    y2 = mm(pmat, fz)                                     # (8, TB); rows 4..7 zero

    # ---- Quad(4, 1) ----------------------------------------------------------
    y2_rows = [y2[i:i + 1, :] for i in range(H)]
    feat3 = jnp.concatenate([y2[0:H, :]] + pair_rows(y2_rows) + [ones, zero],
                            axis=0)                       # (16, TB)
    y3 = mm(w3, feat3)                                    # (8, TB); row 0 meaningful
    o_ref[...] = y3[0:1, :].astype(o_ref.dtype)           # (1, TB) lane-dense store


# ----------------------------------------------------------------------------
# Parameters
# ----------------------------------------------------------------------------
def init_params(key):
    ks = jax.random.split(key, 9)

    def rnd(k, shape, fan_in):
        return jax.random.normal(k, shape, jnp.float32) / jnp.sqrt(float(fan_in))

    return dict(
        # Quad(2,4): (in, out) layout
        w1l=rnd(ks[0], (2, 4), 2),
        w1q=rnd(ks[1], (3, 4), 3),          # 3 = 2*(2+1)/2 triu pairs
        b1=rnd(ks[2], (1, 4), 1),
        # MixFun(4,4, second_order): feat dim 14 = 4 + 10, NF*H projections
        wp=rnd(ks[3], (14, NF * H), 14),
        bp=rnd(ks[4], (1, NF * H), 1),
        alpha=rnd(ks[5], (NF, H), 1),       # function-mixing logits
        # Quad(4,1)
        w3l=rnd(ks[6], (4, 1), 4),
        w3q=rnd(ks[7], (10, 1), 10),        # 10 = 4*(4+1)/2 triu pairs
        b3=rnd(ks[8], (1, 1), 1),
    )


def pack_params(params):
    """Pack each layer's weight+bias into one MXU-friendly tile (sublane dims
    padded to multiples of 8), and fold softmax(alpha) into a sparse
    block-diagonal mixing matrix so the mixing step is one matmul.
    All grid-invariant; computed once in the wrapper."""
    f32 = jnp.float32
    # Quad(2,4): (4, 6) -> padded (8, 8)
    w1 = jnp.concatenate([params["w1l"], params["w1q"], params["b1"]], axis=0).T
    w1p = jnp.zeros((8, 8), f32).at[:4, :6].set(w1)
    # MixFun projection: (24, 15) -> padded (24, 16)
    w2 = jnp.concatenate([params["wp"], params["bp"]], axis=0).T
    w2p = jnp.zeros((NF * H, 16), f32).at[:, :15].set(w2)
    # Mixing as a matmul: pmat[o, k*H + o] = softmax(alpha)[k, o]
    p = jax.nn.softmax(params["alpha"], axis=0)                          # (NF, H)
    pmat = jnp.concatenate([jnp.diag(p[k]) for k in range(NF)], axis=1)  # (4, 24)
    pmatp = jnp.zeros((8, NF * H), f32).at[:4, :].set(pmat)
    # Quad(4,1): (1, 15) -> padded (8, 16)
    w3 = jnp.concatenate([params["w3l"], params["w3q"], params["b3"]], axis=0).T
    w3p = jnp.zeros((8, 16), f32).at[:1, :15].set(w3)
    return (w1p.astype(f32), w2p.astype(f32), pmatp.astype(f32), w3p.astype(f32))


# ----------------------------------------------------------------------------
# Wrapper
# ----------------------------------------------------------------------------
def mixfunn_forward(x, params, *, tb=2048):
    B, fin = x.shape
    assert fin == 2, "MixFunn expects 2 input features"
    lane = 128
    # Clamp the batch tile to the (padded) batch so tiny batches stay cheap.
    tb = min(tb, ((B + lane - 1) // lane) * lane)
    assert tb % lane == 0, "batch tile must be lane-dense (multiple of 128)"

    n_blocks = (B + tb - 1) // tb
    Bp = n_blocks * tb
    # Transpose so the batch is on lanes; pad to a whole number of tiles.
    xt = jnp.pad(x.T.astype(jnp.float32), ((0, 0), (0, Bp - B)))
    plist = pack_params(params)

    in_specs = [pl.BlockSpec((fin, tb), lambda i: (0, i))]
    in_specs += [pl.BlockSpec(w.shape, lambda i: (0, 0)) for w in plist]

    out = pl.pallas_call(
        mixfunn_kernel,
        out_shape=jax.ShapeDtypeStruct((1, Bp), jnp.float32),
        grid_spec=pltpu.PrefetchScalarGridSpec(
            num_scalar_prefetch=0,
            grid=(n_blocks,),
            in_specs=in_specs,
            out_specs=pl.BlockSpec((1, tb), lambda i: (0, i)),
        ),
        compiler_params=pltpu.CompilerParams(
            dimension_semantics=("parallel",)),
        cost_estimate=pl.CostEstimate(
            flops=1560 * Bp, transcendentals=20 * Bp, bytes_accessed=12 * Bp),
    )(xt, *plist)

    return out[0, :B][:, None]            # back to (B, 1)


# ----------------------------------------------------------------------------
# Pure-JAX reference (uses the original, unpacked parameters)
# ----------------------------------------------------------------------------
def mixfunn_reference(x, params):
    def pair(y):
        n = y.shape[1]
        return jnp.stack(
            [y[:, i] * y[:, j] for i in range(n) for j in range(i, n)], axis=1)

    y1 = x @ params["w1l"] + pair(x) @ params["w1q"] + params["b1"]
    feat = jnp.concatenate([y1, pair(y1)], axis=1)
    z = feat @ params["wp"] + params["bp"]
    p = jax.nn.softmax(params["alpha"], axis=0)
    y2 = sum(fk(z[:, k * H:(k + 1) * H]) * p[k][None, :]
             for k, fk in enumerate(_FUNCS))
    y3 = y2 @ params["w3l"] + pair(y2) @ params["w3q"] + params["b3"]
    return y3


if __name__ == "__main__":
    key = jax.random.PRNGKey(0)
    kx, kp = jax.random.split(key)

    B = 500    # pads to 512 -> grid of 2 parallel (·, 256) batch tiles
    x = jax.random.normal(kx, (B, 2), jnp.float32)   # e.g. (t, omega) inputs
    params = init_params(kp)

    out = mixfunn_forward(x, params, tb=256)
    out = jax.block_until_ready(out)

    ref = mixfunn_reference(x, params)
    np.testing.assert_allclose(np.asarray(out), np.asarray(ref),
                               rtol=1e-3, atol=1e-3)
    print("KERNEL_OK")
</pallas_src>

<mosaic_0001>
module attributes {stable_mosaic.version = 11 : i64} {
  func.func @mixfunn_kernel(%arg0: i32, %arg1: memref<2x256xf32, #tpu.memory_space<vmem>>, %arg2: memref<8x8xf32, #tpu.memory_space<vmem>>, %arg3: memref<24x16xf32, #tpu.memory_space<vmem>>, %arg4: memref<8x24xf32, #tpu.memory_space<vmem>>, %arg5: memref<8x16xf32, #tpu.memory_space<vmem>>, %arg6: memref<1x256xf32, #tpu.memory_space<vmem>>) attributes {dimension_semantics = [#tpu.dimension_semantics<parallel>], iteration_bounds = array<i64: 2>, scalar_prefetch = 0 : i64, scratch_operands = 0 : i64, tpu.core_type = #tpu.core_type<tc>, window_params = [{transform_indices = @transform_0, window_bounds = array<i64: 2, 256>}, {pipeline_mode = #tpu.pipeline_mode<synchronous>, transform_indices = @transform_1, window_bounds = array<i64: 8, 8>}, {pipeline_mode = #tpu.pipeline_mode<synchronous>, transform_indices = @transform_2, window_bounds = array<i64: 24, 16>}, {pipeline_mode = #tpu.pipeline_mode<synchronous>, transform_indices = @transform_3, window_bounds = array<i64: 8, 24>}, {pipeline_mode = #tpu.pipeline_mode<synchronous>, transform_indices = @transform_4, window_bounds = array<i64: 8, 16>}, {transform_indices = @transform_5, window_bounds = array<i64: 1, 256>}]} {
    %c0 = arith.constant 0 : index
    %c0_0 = arith.constant 0 : index
    %0 = vector.load %arg1[%c0, %c0_0] : memref<2x256xf32, #tpu.memory_space<vmem>>, vector<2x256xf32>
    %c0_1 = arith.constant 0 : index
    %c0_2 = arith.constant 0 : index
    %1 = vector.load %arg2[%c0_1, %c0_2] : memref<8x8xf32, #tpu.memory_space<vmem>>, vector<8x8xf32>
    %c0_3 = arith.constant 0 : index
    %c0_4 = arith.constant 0 : index
    %2 = vector.load %arg3[%c0_3, %c0_4] : memref<24x16xf32, #tpu.memory_space<vmem>>, vector<24x16xf32>
    %c0_5 = arith.constant 0 : index
    %c0_6 = arith.constant 0 : index
    %3 = vector.load %arg4[%c0_5, %c0_6] : memref<8x24xf32, #tpu.memory_space<vmem>>, vector<8x24xf32>
    %c0_7 = arith.constant 0 : index
    %c0_8 = arith.constant 0 : index
    %4 = vector.load %arg5[%c0_7, %c0_8] : memref<8x16xf32, #tpu.memory_space<vmem>>, vector<8x16xf32>
    %cst = arith.constant 1.000000e+00 : f32
    %5 = vector.broadcast %cst : f32 to vector<1x256xf32>
    %cst_9 = arith.constant 0.000000e+00 : f32
    %6 = vector.broadcast %cst_9 : f32 to vector<1x256xf32>
    %7 = vector.extract_strided_slice %0 {offsets = [0, 0], sizes = [1, 256], strides = [1, 1]} : vector<2x256xf32> to vector<1x256xf32>
    %8 = vector.extract_strided_slice %0 {offsets = [1, 0], sizes = [1, 256], strides = [1, 1]} : vector<2x256xf32> to vector<1x256xf32>
    %9 = arith.mulf %7, %7 : vector<1x256xf32>
    %10 = arith.mulf %7, %8 : vector<1x256xf32>
    %11 = arith.mulf %8, %8 : vector<1x256xf32>
    %12 = tpu.concatenate %7, %8, %9, %10, %11, %5, %6, %6 in 0 : vector<1x256xf32>, vector<1x256xf32>, vector<1x256xf32>, vector<1x256xf32>, vector<1x256xf32>, vector<1x256xf32>, vector<1x256xf32>, vector<1x256xf32> -> vector<8x256xf32>
    %cst_10 = arith.constant dense<0.000000e+00> : vector<8x256xf32>
    %13 = tpu.matmul %1, %12, %cst_10 {dimension_numbers = #tpu.dot_dimension_numbers<[1], [0], [0], [1], [0, 0, 1, 1], [], []>, precision = #tpu.contract_precision<fp32>} : vector<8x8xf32>, vector<8x256xf32>, vector<8x256xf32> -> vector<8x256xf32>
    %14 = vector.extract_strided_slice %13 {offsets = [0, 0], sizes = [1, 256], strides = [1, 1]} : vector<8x256xf32> to vector<1x256xf32>
    %15 = vector.extract_strided_slice %13 {offsets = [1, 0], sizes = [1, 256], strides = [1, 1]} : vector<8x256xf32> to vector<1x256xf32>
    %16 = vector.extract_strided_slice %13 {offsets = [2, 0], sizes = [1, 256], strides = [1, 1]} : vector<8x256xf32> to vector<1x256xf32>
    %17 = vector.extract_strided_slice %13 {offsets = [3, 0], sizes = [1, 256], strides = [1, 1]} : vector<8x256xf32> to vector<1x256xf32>
    %18 = vector.extract_strided_slice %13 {offsets = [0, 0], sizes = [4, 256], strides = [1, 1]} : vector<8x256xf32> to vector<4x256xf32>
    %19 = arith.mulf %14, %14 : vector<1x256xf32>
    %20 = arith.mulf %14, %15 : vector<1x256xf32>
    %21 = arith.mulf %14, %16 : vector<1x256xf32>
    %22 = arith.mulf %14, %17 : vector<1x256xf32>
    %23 = arith.mulf %15, %15 : vector<1x256xf32>
    %24 = arith.mulf %15, %16 : vector<1x256xf32>
    %25 = arith.mulf %15, %17 : vector<1x256xf32>
    %26 = arith.mulf %16, %16 : vector<1x256xf32>
    %27 = arith.mulf %16, %17 : vector<1x256xf32>
    %28 = arith.mulf %17, %17 : vector<1x256xf32>
    %29 = tpu.concatenate %18, %19, %20, %21, %22, %23, %24, %25, %26, %27, %28, %5, %6 in 0 : vector<4x256xf32>, vector<1x256xf32>, vector<1x256xf32>, vector<1x256xf32>, vector<1x256xf32>, vector<1x256xf32>, vector<1x256xf32>, vector<1x256xf32>, vector<1x256xf32>, vector<1x256xf32>, vector<1x256xf32>, vector<1x256xf32>, vector<1x256xf32> -> vector<16x256xf32>
    %cst_11 = arith.constant dense<0.000000e+00> : vector<24x256xf32>
    %30 = tpu.matmul %2, %29, %cst_11 {dimension_numbers = #tpu.dot_dimension_numbers<[1], [0], [0], [1], [0, 0, 1, 1], [], []>, precision = #tpu.contract_precision<fp32>} : vector<24x16xf32>, vector<16x256xf32>, vector<24x256xf32> -> vector<24x256xf32>
    %31 = vector.extract_strided_slice %30 {offsets = [0, 0], sizes = [4, 256], strides = [1, 1]} : vector<24x256xf32> to vector<4x256xf32>
    %32 = vector.extract_strided_slice %30 {offsets = [4, 0], sizes = [4, 256], strides = [1, 1]} : vector<24x256xf32> to vector<4x256xf32>
    %33 = math.sin %32 : vector<4x256xf32>
    %34 = vector.extract_strided_slice %30 {offsets = [8, 0], sizes = [4, 256], strides = [1, 1]} : vector<24x256xf32> to vector<4x256xf32>
    %35 = math.cos %34 : vector<4x256xf32>
    %36 = vector.extract_strided_slice %30 {offsets = [12, 0], sizes = [4, 256], strides = [1, 1]} : vector<24x256xf32> to vector<4x256xf32>
    %37 = math.tanh %36 : vector<4x256xf32>
    %38 = vector.extract_strided_slice %30 {offsets = [16, 0], sizes = [4, 256], strides = [1, 1]} : vector<24x256xf32> to vector<4x256xf32>
    %39 = vector.extract_strided_slice %30 {offsets = [16, 0], sizes = [4, 256], strides = [1, 1]} : vector<24x256xf32> to vector<4x256xf32>
    %40 = arith.mulf %38, %39 : vector<4x256xf32>
    %cst_12 = arith.constant 0.000000e+00 : f32
    %41 = vector.broadcast %cst_12 : f32 to vector<4x256xf32>
    %42 = arith.subf %41, %40 : vector<4x256xf32>
    %43 = math.exp %42 : vector<4x256xf32>
    %44 = vector.extract_strided_slice %30 {offsets = [20, 0], sizes = [4, 256], strides = [1, 1]} : vector<24x256xf32> to vector<4x256xf32>
    %45 = math.exp %44 : vector<4x256xf32>
    %46 = tpu.concatenate %31, %33, %35, %37, %43, %45 in 0 : vector<4x256xf32>, vector<4x256xf32>, vector<4x256xf32>, vector<4x256xf32>, vector<4x256xf32>, vector<4x256xf32> -> vector<24x256xf32>
    %cst_13 = arith.constant dense<0.000000e+00> : vector<8x256xf32>
    %47 = tpu.matmul %3, %46, %cst_13 {dimension_numbers = #tpu.dot_dimension_numbers<[1], [0], [0], [1], [0, 0, 1, 1], [], []>, precision = #tpu.contract_precision<fp32>} : vector<8x24xf32>, vector<24x256xf32>, vector<8x256xf32> -> vector<8x256xf32>
    %48 = vector.extract_strided_slice %47 {offsets = [0, 0], sizes = [1, 256], strides = [1, 1]} : vector<8x256xf32> to vector<1x256xf32>
    %49 = vector.extract_strided_slice %47 {offsets = [1, 0], sizes = [1, 256], strides = [1, 1]} : vector<8x256xf32> to vector<1x256xf32>
    %50 = vector.extract_strided_slice %47 {offsets = [2, 0], sizes = [1, 256], strides = [1, 1]} : vector<8x256xf32> to vector<1x256xf32>
    %51 = vector.extract_strided_slice %47 {offsets = [3, 0], sizes = [1, 256], strides = [1, 1]} : vector<8x256xf32> to vector<1x256xf32>
    %52 = vector.extract_strided_slice %47 {offsets = [0, 0], sizes = [4, 256], strides = [1, 1]} : vector<8x256xf32> to vector<4x256xf32>
    %53 = arith.mulf %48, %48 : vector<1x256xf32>
    %54 = arith.mulf %48, %49 : vector<1x256xf32>
    %55 = arith.mulf %48, %50 : vector<1x256xf32>
    %56 = arith.mulf %48, %51 : vector<1x256xf32>
    %57 = arith.mulf %49, %49 : vector<1x256xf32>
    %58 = arith.mulf %49, %50 : vector<1x256xf32>
    %59 = arith.mulf %49, %51 : vector<1x256xf32>
    %60 = arith.mulf %50, %50 : vector<1x256xf32>
    %61 = arith.mulf %50, %51 : vector<1x256xf32>
    %62 = arith.mulf %51, %51 : vector<1x256xf32>
    %63 = tpu.concatenate %52, %53, %54, %55, %56, %57, %58, %59, %60, %61, %62, %5, %6 in 0 : vector<4x256xf32>, vector<1x256xf32>, vector<1x256xf32>, vector<1x256xf32>, vector<1x256xf32>, vector<1x256xf32>, vector<1x256xf32>, vector<1x256xf32>, vector<1x256xf32>, vector<1x256xf32>, vector<1x256xf32>, vector<1x256xf32>, vector<1x256xf32> -> vector<16x256xf32>
    %cst_14 = arith.constant dense<0.000000e+00> : vector<8x256xf32>
    %64 = tpu.matmul %4, %63, %cst_14 {dimension_numbers = #tpu.dot_dimension_numbers<[1], [0], [0], [1], [0, 0, 1, 1], [], []>, precision = #tpu.contract_precision<fp32>} : vector<8x16xf32>, vector<16x256xf32>, vector<8x256xf32> -> vector<8x256xf32>
    %65 = vector.extract_strided_slice %64 {offsets = [0, 0], sizes = [1, 256], strides = [1, 1]} : vector<8x256xf32> to vector<1x256xf32>
    %c0_15 = arith.constant 0 : index
    %c0_16 = arith.constant 0 : index
    %66 = vector.load %arg6[%c0_15, %c0_16] : memref<1x256xf32, #tpu.memory_space<vmem>>, vector<1x256xf32>
    tpu.vector_store %arg6[%c0_15, %c0_16], %65 {strides = array<i32>} : memref<1x256xf32, #tpu.memory_space<vmem>>, vector<1x256xf32>,
    return
  }
  func.func @transform_0(%arg0: i32) -> (i32, i32) {
    %c0_i32 = arith.constant 0 : i32
    %c0_i32_0 = arith.constant 0 : i32
    return %c0_i32, %arg0 : i32, i32
  }
  func.func @transform_1(%arg0: i32) -> (i32, i32) {
    %c0_i32 = arith.constant 0 : i32
    %c0_i32_0 = arith.constant 0 : i32
    %c0_i32_1 = arith.constant 0 : i32
    return %c0_i32, %c0_i32_0 : i32, i32
  }
  func.func @transform_2(%arg0: i32) -> (i32, i32) {
    %c0_i32 = arith.constant 0 : i32
    %c0_i32_0 = arith.constant 0 : i32
    %c0_i32_1 = arith.constant 0 : i32
    return %c0_i32, %c0_i32_0 : i32, i32
  }
  func.func @transform_3(%arg0: i32) -> (i32, i32) {
    %c0_i32 = arith.constant 0 : i32
    %c0_i32_0 = arith.constant 0 : i32
    %c0_i32_1 = arith.constant 0 : i32
    return %c0_i32, %c0_i32_0 : i32, i32
  }
  func.func @transform_4(%arg0: i32) -> (i32, i32) {
    %c0_i32 = arith.constant 0 : i32
    %c0_i32_0 = arith.constant 0 : i32
    %c0_i32_1 = arith.constant 0 : i32
    return %c0_i32, %c0_i32_0 : i32, i32
  }
  func.func @transform_5(%arg0: i32) -> (i32, i32) {
    %c0_i32 = arith.constant 0 : i32
    %c0_i32_0 = arith.constant 0 : i32
    return %c0_i32, %arg0 : i32, i32
  }
}

</mosaic_0001>

<bundles_post_ra>
// kernel: tpu_custom_call.1
= control target key start
LH: loop header
LB: loop body
LE: loop exit
PB: predicated region body
PF: predicated region fallthrough
CT: control target
= control target key end

     0   :  { %10 = vsyncpa [#allocation3], 0  ;;  %s4052_s0 = inlined_call_operand.vmem [shape: f32[2,512], index: 0, kind: input, shape index: {}]   ;;  %s4053_s1 = inlined_call_operand.vmem [shape: f32[8,8], index: 1, kind: input, shape index: {}]   ;;  %s4054_s2 = inlined_call_operand.vmem [shape: f32[24,16], index: 2, kind: input, shape index: {}]   ;;  %s4055_s3 = inlined_call_operand.vmem [shape: f32[8,24], index: 3, kind: input, shape index: {}]   ;;  %s4056_s4 = inlined_call_operand.vmem [shape: f32[8,16], index: 4, kind: input, shape index: {}]   ;;  %s4057_s5 = inlined_call_operand.hbm [shape: f32[1,512], index: 5, kind: output, shape index: {}]  }
   0x1   :  { %12 = vsyncpa [#allocation3 + $0x1], 0  ;;  %s3458_s18 = smov 0   ;;  %s3460_s19 = smov 0  }
   0x2   :  { %s3462_s20 = smov 0   ;;  %s3464_s21 = smov 0  }
   0x3 LB: > { %s3479_s22 = sadd.s32 4294967295, %s3417_s21   ;;  %s3102_s23 = sadd.s32 4294967294, %s3417_s21   ;;  %s3417_s21 = sphi %s3464_s21, %s4071_s21   ;;  %s3413_s20 = sphi %s3462_s20, %s4070_s20   ;;  %s3409_s19 = sphi %s3460_s19, %s4069_s19   ;;  %s3405_s18 = sphi %s3458_s18, %s4068_s18  }
   0x4   : > { %s3483_s24 = sadd.s32 1, %s3417_s21   ;;  %s135_s25 = sadd.s32 1, %s3413_s20 }
   0x5   : > { %s132_s26 = ssub.s32 %s3417_s21, %s3483_s24  ;;  %p145_p0 = scmp.ne.s32.totalorder %s3413_s20, %s3409_s19 }
   0x6   : > { %p133_p1 = scmp.eq.s32.totalorder %s132_s26, 0  ;;  %p146_p2 = scmp.eq.s32.totalorder %s3479_s22, 1 }
   0x7   : > { %p151_p3 = scmp.ne.s32.totalorder %s3409_s19, %s3405_s18  ;;  %p152_p4 = scmp.eq.s32.totalorder %s3102_s23, 1 }
   0x8   : > { %s3494_s27 = scalar_select %p133_p1, %s3413_s20, %s135_s25  }
   0x9   : > { %p3496_p5 = por %p146_p2, %p145_p0  ;;  %p3500_p6 = por %p152_p4, %p151_p3 }
   0xa   : > { %p3105_p7 = scmp.ge.s32.totalorder %s3417_s21, 1  ;;  %p191_p8 = scmp.lt.s32.totalorder %s3417_s21, 3 }
   0xc   : > { %p192_p9 = pnand %p3105_p7, %p191_p8 }
   0xd   : > { %s3107_s30 = sshll.u32 (!%p192_p9), %s3479_s22, 1  ;;  %v239_v0 = vlaneseq (!%p192_p9)  ;;  %v227_v1 = vld [vmem:[%s4053_s1] sm:$0xff] (!%p192_p9)  ;;  %vm312_vm0 = vcmask (!%p192_p9), 64512   ;;  %v3419_v3 = vmov (!%p192_p9), 0.0   ;;  %vm291_vm1 = vcmask (!%p192_p9), 1040384   ;;  %v229_v54 = vld [vmem:[%s4054_s2 + $0x8] sm:$0xff] (!%p192_p9) }
   0xe   : > { %195 = sbr.rel (%p192_p9) target bundleno = 1278 (0x4fe), region = 40  ;;  %p220_p10 = scmp.lt.s32.totalorder (!%p192_p9), %s3107_s30, 3  ;;  %382 = vmatprep.mubr.f32.mxu0 (!%p192_p9), %v3419_v3  ;;  %v314_v4 = vsel (!%p192_p9), %vm312_vm0, %v227_v1, 0  ;;  %947 = vmatprep.mubr.f32.mxu1 (!%p192_p9), %v3419_v3  ;;  %vm294_vm2 = vcmask (!%p192_p9), 1041408   ;;  %vm297_vm3 = vcmask (!%p192_p9), 1042432   ;;  %vm300_vm4 = vcmask (!%p192_p9), 1043456  }
   0xf   : > { %v3511_v2 = vshrl.u32 (!%p192_p9), %v239_v0, 7  ;;  %v3519_v9 = vand.u32 (!%p192_p9), 4294901760, %v314_v4  ;;  %vm303_vm5 = vcmask (!%p192_p9), 1044480   ;;  %vm306_vm6 = vcmask (!%p192_p9), 1045504   ;;  %v228_v52 = vld [vmem:[%s4054_s2] sm:$0xff] (!%p192_p9)  ;;  %v230_v59 = vld [vmem:[%s4054_s2 + $0x10] sm:$0xff] (!%p192_p9) }
  0x10   : > { %vm309_vm7 = vcmask (!%p192_p9), 1046528   ;;  %vm869_vm8 = vcmask (!%p192_p9), 130048   ;;  %s216_s6 = sand.u32 (!%p192_p9), 1, %s3409_s19  }
  0x11   : > { %v245_v5 = vsub.s32 (!%p192_p9), 2, %v3511_v2  ;;  %v255_v6 = vsub.s32 (!%p192_p9), 3, %v3511_v2  ;;  %v241_v7 = vsub.s32 (!%p192_p9), 0, %v3511_v2  ;;  %v251_v8 = vsub.s32 (!%p192_p9), 1, %v3511_v2  ;;  %s3106_s7 = sshll.u32 (!%p192_p9), %s216_s6, 1  ;;  %s3029_s14 = scalar_lea.sflag (!%p192_p9), [#allocation3], %s216_s6 }
  0x12   : > { %v384_v11 = vsub.f32 (!%p192_p9), %v314_v4, %v3519_v9  ;;  %v871_v53 = vsel (!%p192_p9), %vm869_vm8, %v228_v52, 0  ;;  %v874_v56 = vsel (!%p192_p9), %vm869_vm8, %v229_v54, 0  ;;  %v3571_v63 = vsel (!%p192_p9), %vm869_vm8, %v230_v59, 0  ;;  %s218_s9 = scalar_lea.vmem (!%p192_p9), [#allocation2], %s3106_s7 }
  0x13   : > { %v3555_v55 = vand.u32 (!%p192_p9), 4294901760, %v871_v53  ;;  %v3561_v58 = vand.u32 (!%p192_p9), 4294901760, %v874_v56  ;;  %s3043_s10 = sshll.u32 (!%p192_p9), %s218_s9, 4  ;;  %s4012_s10 = int_to_ptr.vmem [resolvable:$true] %s3043_s10 }
  0x14   : > { %v385_v21 = vand.u32 (!%p192_p9), 4294901760, %v384_v11  ;;  %s3355_s15 = scalar_lea.vmem (!%p192_p9), %s4012_s10, 32 }
  0x15   : > { %s4073_s30 = smov (!%p220_p10, %s3107_s30), 3  ;;  %v3559_v57 = vsub.f32 %v871_v53, %v3555_v55  ;;  %v3568_v62 = vsub.f32 %v874_v56, %v3561_v58  ;;  %p3356_p11 = scmp.ne.s32.totalorder %s4012_s10, %s3355_s15 }
  0x16   : > { %s3108_s8 = sshll.u32 %s4073_s30, 1  ;;  %v386_v34 = vsub.f32 %v384_v11, %v385_v21 }
  0x17   : > { %s223_s11 = scalar_lea.vmem %s4052_s0, %s3108_s8  ;;  %v950_v61 = vand.u32 4294901760, %v3559_v57  ;;  %s3131_s8 = sshll.u32 %s3479_s22, 5 }
  0x18   : > { %v226_v10 = vld [vmem:[%s223_s11] sm:$0xf]  ;;  %v387_v43 = vand.u32 4294901760, %v386_v34  ;;  %s4010_s13 = scalar_lea.hbm %s4057_s5, %s3131_s8  ;;  %p3357_p12 = pnand %p3356_p11, %p3496_p5 }
  0x19   : > { %v233_v12 = vmul.f32 %v226_v10, %v226_v10  ;;  %v3109_v13 = vrot.slane %v226_v10, 9  ;;  %v246_v14 = vrot.slane %v226_v10, %v245_v5  ;;  %v256_v15 = vrot.slane %v226_v10, %v255_v6  ;;  %s3427_s22 = smov [#allocation2]  }
  0x1a   : > { %v242_v16 = vrot.slane %v226_v10, %v241_v7  ;;  %v252_v17 = vrot.slane %v226_v10, %v251_v8  ;;  %p3358_p13 = pneg %p3357_p12  ;;  %s3359_s16 = sshll.u32 %s3427_s22, 4  ;;  %s3360_s16 = int_to_ptr.vmem [resolvable:$false] %s3359_s16 }
  0x1b   : > { %v238_v18 = vmul.f32 %v3109_v13, %v226_v10  ;;  %v267_v19 = vrot.slane %v233_v12, %v245_v5  ;;  %v293_v20 = vsel %vm291_vm1, %v246_v14, %v256_v15  ;;  %v288_v22 = vrot.slane %v233_v12, %v255_v6  ;;  %s3361_s17 = scalar_lea.vmem %s3360_s16, 64  ;;  %p3362_p0 = scmp.lt.s32.totalorder %s4012_s10, %s3360_s16 }
  0x1c   : > { %v263_v23 = vrot.slane %v233_v12, %v241_v7  ;;  %v284_v24 = vrot.slane %v233_v12, %v251_v8  ;;  %v292_v25 = vsel %vm291_vm1, %v242_v16, %v252_v17  ;;  %v3574_v15 = vand.u32 4294901760, %v3571_v63  ;;  %p3363_p1 = scmp.lt.s32.totalorder %s3361_s17, %s3355_s15 }
  0x1d   : > { %v278_v26 = vrot.slane %v238_v18, %v245_v5  ;;  %v296_v27 = vsel %vm294_vm2, %v293_v20, %v267_v19  ;;  %v274_v28 = vrot.slane %v238_v18, %v241_v7 }
  0x1e   : > { %v295_v29 = vsel %vm294_vm2, %v292_v25, %v263_v23  ;;  %p3364_p2 = por %p3363_p1, %p3362_p0 }
  0x1f   : > { %v299_v30 = vsel %vm297_vm3, %v296_v27, %v278_v26  ;;  %v298_v31 = vsel %vm297_vm3, %v295_v29, %v274_v28 }
  0x20   : > { %v302_v32 = vsel %vm300_vm4, %v299_v30, %v288_v22  ;;  %v301_v33 = vsel %vm300_vm4, %v298_v31, %v284_v24  ;;  %p3365_p3 = pnand %p3364_p2, %p3358_p13 }
  0x21   : > { %v305_v35 = vsel %vm303_vm5, %v302_v32, 1.0  ;;  %v304_v36 = vsel %vm303_vm5, %v301_v33, 1.0 }
  0x22   : > { %v308_v37 = vsel %vm306_vm6, %v305_v35, 0.0  ;;  %v307_v38 = vsel %vm306_vm6, %v304_v36, 0.0 }
  0x23   : > { %v311_v39 = vsel %vm309_vm7, %v308_v37, 0.0  ;;  %v310_v40 = vsel %vm309_vm7, %v307_v38, 0.0 }
  0x24   : > { %v316_v41 = vand.u32 4294901760, %v311_v39  ;;  %v318_v42 = vand.u32 4294901760, %v310_v40 }
  0x26   : > { %317 = vmatprep.subr.mxu0 %v316_v41  ;;  %v401_v44 = vsub.f32 %v310_v40, %v318_v42  ;;  %v395_v45 = vsub.f32 %v311_v39, %v316_v41 }
  0x27   : > { %319 = vmatpush1.msra.mxu0 %v318_v42 }
  0x28   : > { %388 = vmatmul.mubr.f32.vlgmr.msra.gmra.mrb[0].mxu0 %v387_v43  ;;  %v396_v46 = vand.u32 4294901760, %v395_v45  ;;  %v402_v47 = vand.u32 4294901760, %v401_v44 }
  0x29   : > { %468 = vmatprep.mubr.f32.mxu0 %v3419_v3 }
  0x2a   : > { %v397_v48 = vsub.f32 %v395_v45, %v396_v46  ;;  %v403_v49 = vsub.f32 %v401_v44, %v402_v47 }
  0x2c   : > { %v398_v50 = vand.u32 4294901760, %v397_v48  ;;  %v404_v51 = vand.u32 4294901760, %v403_v49 }
  0x2e   : > { %399 = vmatprep.subr.mxu0 %v398_v50 }
  0x2f   : > { %405 = vmatpush1.msra.mxu0 %v404_v51 }
  0x30   : > { %470 = vmatmul.mubr.f32.vlgmr.msra.gmra.mrb[0].mxu0 %v3519_v9  ;;  %478 = vmatprep.subr.mxu0 %v395_v45 }
  0x31   : > { %481 = vmatpush1.msra.mxu0 %v401_v44  ;;  %544 = vmatprep.mubr.f32.mxu0 %v3419_v3 }
  0x32   : > { %554 = vmatprep.subr.mxu0 %v316_v41 }
  0x38   : > { %547 = vmatmul.mubr.f32.vlgmr.msra.gmra.mrb[0].mxu0 %v384_v11 }
  0x39   : > { %556 = vmatpush1.msra.mxu0 %v318_v42  ;;  %619 = vmatprep.mubr.f32.mxu0 %v3419_v3 }
  0x3a   : > { %632 = vmatprep.subr.mxu0 %v396_v46 }
  0x40   : > { %623 = vmatmul.mubr.f32.vlgmr.msra.gmra.mrb[0].mxu0 %v385_v21 }
  0x41   : > { %636 = vmatpush1.msra.mxu0 %v402_v47  ;;  %699 = vmatprep.mubr.f32.mxu0 %v3419_v3 }
  0x42   : > { %708 = vmatprep.subr.mxu0 %v316_v41 }
  0x48   : > { %701 = vmatmul.mubr.f32.vlgmr.msra.gmra.mrb[0].mxu0 %v3519_v9 }
  0x49   : > { %710 = vmatpush1.msra.mxu0 %v318_v42  ;;  %773 = vmatprep.mubr.f32.mxu0 %v3419_v3 }
  0x50   : > { %775 = vmatmul.mubr.f32.vlgmr.msra.gmra.mrb[0].mxu0 %v3519_v9 }
  0x51   : > { %2082 = vmatprep.mubr.f32.mxu0 %v3419_v3 }
 0x123   : > { %v776_v60 = vpop.f32.mrb[0].mxu0 }
 0x124   : > { %v781_v1 = vmul.f32 %v776_v60, %v776_v60  ;;  %v785_v4 = vrot.slane %v776_v60, 1  ;;  %v778_v5 = vpop.f32.mrb[1].mxu0  ;;  %v791_v6 = vrot.slane %v776_v60, 2  ;;  %v797_v7 = vrot.slane %v776_v60, 3 }
 0x125   : > { %v782_v8 = vmul.f32 %v778_v5, %v778_v5  ;;  %v786_v9 = vrot.slane %v778_v5, 1  ;;  %v792_v10 = vrot.slane %v778_v5, 2  ;;  %v798_v11 = vrot.slane %v778_v5, 3 }
 0x126   : > { %v789_v12 = vmul.f32 %v785_v4, %v776_v60  ;;  %v795_v13 = vmul.f32 %v791_v6, %v776_v60  ;;  %v801_v14 = vmul.f32 %v797_v7, %v776_v60  ;;  %v805_v23 = vrot.slane %v781_v1, 4 }
 0x127   : > { %v790_v16 = vmul.f32 %v786_v9, %v778_v5  ;;  %v796_v17 = vmul.f32 %v792_v10, %v778_v5  ;;  %v802_v18 = vmul.f32 %v798_v11, %v778_v5  ;;  %v806_v19 = vrot.slane %v782_v8, 4 }
 0x128   : > { %v828_v20 = vrot.slane %v782_v8, 1  ;;  %v836_v21 = vrot.slane %v782_v8, 7  ;;  %v844_v22 = vrot.slane %v782_v8, 6  ;;  %v811_v27 = vrot.slane %v789_v12, 3 }
 0x129   : > { %v812_v24 = vrot.slane %v790_v16, 3  ;;  %v818_v25 = vrot.slane %v796_v17, 2  ;;  %v832_v26 = vrot.slane %v796_v17, 7  ;;  %v824_v28 = vrot.slane %v802_v18, 1 }
 0x12a   : > { %v840_v29 = vrot.slane %v790_v16, 6  ;;  %v848_v30 = vsel %vm300_vm4, %v778_v5, %v806_v19  ;;  %v856_v31 = vsel %vm291_vm1, %v828_v20, %v790_v16  ;;  %v817_v34 = vrot.slane %v795_v13, 2 }
 0x12b   : > { %v850_v32 = vsel %vm303_vm5, %v848_v30, %v812_v24  ;;  %v858_v33 = vsel %vm294_vm2, %v856_v31, %v832_v26  ;;  %v827_v35 = vrot.slane %v781_v1, 1  ;;  %v823_v38 = vrot.slane %v801_v14, 1 }
 0x12c   : > { %v852_v36 = vsel %vm306_vm6, %v850_v32, %v818_v25  ;;  %v860_v37 = vsel %vm297_vm3, %v858_v33, %v836_v21  ;;  %v831_v39 = vrot.slane %v795_v13, 7  ;;  %v835_v42 = vrot.slane %v781_v1, 7 }
 0x12d   : > { %v854_v40 = vsel %vm309_vm7, %v852_v36, %v824_v28  ;;  %v862_v41 = vsel %vm300_vm4, %v860_v37, %v840_v29  ;;  %v839_v43 = vrot.slane %v789_v12, 6  ;;  %v847_v46 = vsel %vm300_vm4, %v776_v60, %v805_v23 }
 0x12e   : > { %v864_v44 = vsel %vm303_vm5, %v862_v41, %v844_v22  ;;  %v879_v45 = vand.u32 4294901760, %v854_v40  ;;  %v855_v47 = vsel %vm291_vm1, %v827_v35, %v789_v12  ;;  %v843_v49 = vrot.slane %v781_v1, 6 }
 0x12f   : > { %v866_v48 = vsel %vm306_vm6, %v864_v44, 1.0  ;;  %v849_v50 = vsel %vm303_vm5, %v847_v46, %v811_v27  ;;  %v857_v51 = vsel %vm294_vm2, %v855_v47, %v831_v39  ;;  %v951_v10 = vsub.f32 %v3559_v57, %v950_v61 }
 0x130   : > { %v868_v52 = vsel %vm309_vm7, %v866_v48, 0.0  ;;  %v982_v53 = vsub.f32 %v854_v40, %v879_v45  ;;  %v851_v54 = vsel %vm306_vm6, %v849_v50, %v817_v34  ;;  %v859_v56 = vsel %vm297_vm3, %v857_v51, %v835_v42 }
 0x131   : > { %v883_v59 = vand.u32 4294901760, %v868_v52  ;;  %v853_v4 = vsel %vm309_vm7, %v851_v54, %v823_v38  ;;  %v861_v60 = vsel %vm300_vm4, %v859_v56, %v839_v43  ;;  %v961_v13 = vand.u32 4294901760, %v3568_v62 }
 0x132   : > { %v863_v5 = vsel %vm303_vm5, %v861_v60, %v843_v49  ;;  %v881_v6 = vand.u32 4294901760, %v853_v4  ;;  %v983_v1 = vand.u32 4294901760, %v982_v53  ;;  %v971_v14 = vsub.f32 %v3571_v63, %v3574_v15 }
 0x133   : > { %v3596_v7 = vpack.c.bf16 %v883_v59, %v879_v45  ;;  %v994_v8 = vsub.f32 %v868_v52, %v883_v59  ;;  %v865_v9 = vsel %vm306_vm6, %v863_v5, 1.0  ;;  %v952_v23 = vand.u32 4294901760, %v951_v10 }
 0x134   : > { %v867_v11 = vsel %vm309_vm7, %v865_v9, 0.0  ;;  %v988_v12 = vsub.f32 %v853_v4, %v881_v6  ;;  %v984_v17 = vsub.f32 %v982_v53, %v983_v1  ;;  %v962_v24 = vsub.f32 %v3568_v62, %v961_v13 }
 0x135   : > { %3133 = vmatprep.subr.bf16.mxu1 %v3596_v7  ;;  %v885_v16 = vand.u32 4294901760, %v867_v11  ;;  %v995_v18 = vand.u32 4294901760, %v994_v8  ;;  %v972_v25 = vand.u32 4294901760, %v971_v14  ;;  %v3140_v36 = vpack.c.bf16 %v994_v8, %v982_v53 }
 0x136   : > { %v989_v19 = vand.u32 4294901760, %v988_v12  ;;  %v985_v26 = vand.u32 4294901760, %v984_v17  ;;  %v963_v31 = vand.u32 4294901760, %v962_v24  ;;  %v3421_v17 = vmov 2475754826  }
 0x137   : > { %v3134_v20 = vpack.c.bf16 %v885_v16, %v881_v6  ;;  %v1000_v21 = vsub.f32 %v867_v11, %v885_v16  ;;  %v996_v22 = vsub.f32 %v994_v8, %v995_v18  ;;  %v973_v32 = vsub.f32 %v971_v14, %v972_v25 }
 0x138   : > { %v990_v28 = vsub.f32 %v988_v12, %v989_v19  ;;  %v3148_v39 = vpack.c.bf16 %v995_v18, %v983_v1 }
 0x139   : > { %3135 = vmatpush1.bf16.msra.mxu1 %v3134_v20  ;;  %v997_v27 = vand.u32 4294901760, %v996_v22  ;;  %v1001_v29 = vand.u32 4294901760, %v1000_v21  ;;  %v974_v37 = vand.u32 4294901760, %v973_v32  ;;  %v3142_v38 = vpack.c.bf16 %v1000_v21, %v988_v12 }
 0x13a   : > { %v991_v33 = vand.u32 4294901760, %v990_v28  ;;  %v3420_v12 = vmov 683565275  }
 0x13b   : > { %v3136_v30 = vpack.c.bf16 %v997_v27, %v985_v26  ;;  %v1002_v63 = vsub.f32 %v1000_v21, %v1001_v29  ;;  %v3150_v40 = vpack.c.bf16 %v1001_v29, %v989_v19  ;;  %v3422_v19 = vmov 2131351028  }
 0x13c   : > { %953 = vmatmul.mubr.f32.vlgmr.msra.gmra.mrb[0].mxu1 %v952_v23  ;;  %v3423_v21 = vmov 2102212464   ;;  %v3424_v23 = vmov 920167782  }
 0x13d   : > { %958 = vmatprep.mubr.f32.mxu1 %v3419_v3  ;;  %3137 = vmatprep.subr.bf16.mxu1 %v3136_v30  ;;  %v1003_v34 = vand.u32 4294901760, %v1002_v63  ;;  %v3425_v30 = vmov 1326507024  }
 0x13f   : > { %v3138_v35 = vpack.c.bf16 %v1003_v34, %v991_v33 }
 0x140   : > { %964 = vmatmul.mubr.f32.gmra.mrb[2].mxu1 %v963_v31 }
 0x141   : > { %3139 = vmatpush1.bf16.msra.mxu1 %v3138_v35  ;;  %969 = vmatprep.mubr.f32.mxu1 %v3419_v3 }
 0x142   : > { %3141 = vmatprep.subr.bf16.mxu1 %v3140_v36 }
 0x144   : > { %975 = vmatmul.mubr.f32.gmra.mrb[4].mxu1 %v974_v37 }
 0x145   : > { %1065 = vmatprep.mubr.f32.mxu1 %v3419_v3 }
 0x148   : > { %1067 = vmatmul.mubr.f32.vlgmr.msra.gmra.mrb[0].mxu1 %v3555_v55 }
 0x149   : > { %3143 = vmatpush1.bf16.msra.mxu1 %v3142_v38  ;;  %1072 = vmatprep.mubr.f32.mxu1 %v3419_v3 }
 0x14a   : > { %3145 = vmatprep.subr.bf16.mxu1 %v3596_v7 }
 0x14c   : > { %1074 = vmatmul.mubr.f32.gmra.mrb[2].mxu1 %v3561_v58 }
 0x14d   : > { %1079 = vmatprep.mubr.f32.mxu1 %v3419_v3 }
 0x150   : > { %1081 = vmatmul.mubr.f32.gmra.mrb[4].mxu1 %v3574_v15 }
 0x151   : > { %1159 = vmatprep.mubr.f32.mxu1 %v3419_v3 }
 0x154   : > { %1162 = vmatmul.mubr.f32.vlgmr.msra.gmra.mrb[0].mxu1 %v3559_v57 }
 0x155   : > { %3147 = vmatpush1.bf16.msra.mxu1 %v3134_v20  ;;  %1167 = vmatprep.mubr.f32.mxu1 %v3419_v3 }
 0x156   : > { %3149 = vmatprep.subr.bf16.mxu1 %v3148_v39 }
 0x158   : > { %1170 = vmatmul.mubr.f32.gmra.mrb[2].mxu1 %v3568_v62 }
 0x159   : > { %1175 = vmatprep.mubr.f32.mxu1 %v3419_v3 }
 0x15c   : > { %1178 = vmatmul.mubr.f32.gmra.mrb[4].mxu1 %v971_v14 }
 0x15d   : > { %1252 = vmatprep.mubr.f32.mxu1 %v3419_v3 }
 0x160   : > { %1256 = vmatmul.mubr.f32.vlgmr.msra.gmra.mrb[0].mxu1 %v950_v61 }
 0x161   : > { %3151 = vmatpush1.bf16.msra.mxu1 %v3150_v40  ;;  %1261 = vmatprep.mubr.f32.mxu1 %v3419_v3 }
 0x162   : > { %3153 = vmatprep.subr.bf16.mxu1 %v3596_v7 }
 0x164   : > { %1265 = vmatmul.mubr.f32.gmra.mrb[2].mxu1 %v961_v13 }
 0x165   : > { %1270 = vmatprep.mubr.f32.mxu1 %v3419_v3 }
 0x168   : > { %1274 = vmatmul.mubr.f32.gmra.mrb[4].mxu1 %v972_v25 }
 0x169   : > { %1356 = vmatprep.mubr.f32.mxu1 %v3419_v3 }
 0x16c   : > { %1358 = vmatmul.mubr.f32.vlgmr.msra.gmra.mrb[0].mxu1 %v3555_v55 }
 0x16d   : > { %3155 = vmatpush1.bf16.msra.mxu1 %v3134_v20  ;;  %1363 = vmatprep.mubr.f32.mxu1 %v3419_v3 }
 0x170   : > { %1365 = vmatmul.mubr.f32.gmra.mrb[2].mxu1 %v3561_v58 }
 0x171   : > { %1370 = vmatprep.mubr.f32.mxu1 %v3419_v3 }
 0x174   : > { %1372 = vmatmul.mubr.f32.gmra.mrb[4].mxu1 %v3574_v15 }
 0x175   : > { %1446 = vmatprep.mubr.f32.mxu1 %v3419_v3 }
 0x178   : > { %1448 = vmatmul.mubr.f32.vlgmr.msra.gmra.mrb[0].mxu1 %v3555_v55 }
 0x179   : > { %1453 = vmatprep.mubr.f32.mxu1 %v3419_v3 }
 0x17c   : > { %1455 = vmatmul.mubr.f32.gmra.mrb[2].mxu1 %v3561_v58 }
 0x17d   : > { %1460 = vmatprep.mubr.f32.mxu1 %v3419_v3 }
 0x180   : > { %1462 = vmatmul.mubr.f32.gmra.mrb[4].mxu1 %v3574_v15 }
 0x181   : > { %1976 = vmatprep.mubr.f32.mxu1 %v3419_v3 }
 0x24b   : > { %v3641_v57 = vpop.f32.mrb[0].mxu1 }
 0x24c   : > { %v1468_v61 = vand.u32 2147483647, %v3641_v57  ;;  %v1471_v62 = vand.u32 2139095040, %v3641_v57  ;;  %v3645_v41 = vpop.f32.mrb[1].mxu1 }
 0x24d   : > { %v1572_v55 = vand.u32 2147483647, %v3645_v41  ;;  %v1575_v42 = vand.u32 2139095040, %v3645_v41 }
 0x24e   : > { %v1472_v43 = vshrl.u32 %v1471_v62, 23  ;;  %v1475_v58 = vand.u32 8388607, %v1468_v61 }
 0x24f   : > { %v1576_v44 = vshrl.u32 %v1575_v42, 23  ;;  %v1579_v15 = vand.u32 8388607, %v1572_v55  ;;  %v3653_v45 = vpop.f32.mrb[2].mxu1 }
 0x250   : > { %v3110_v46 = vadd.s32 4294967169, %v1472_v43  ;;  %v3655_v47 = vpop.f32.mrb[3].mxu1  ;;  %v1679_v49 = vand.u32 2139095040, %v3653_v45  ;;  %v1476_v51 = vor.u32 8388608, %v1475_v58  ;;  %v1676_v10 = vand.u32 2147483647, %v3653_v45 }
 0x251   : > { %v3114_v48 = vadd.s32 4294967169, %v1576_v44  ;;  %v1580_v52 = vor.u32 8388608, %v1579_v15 }
 0x252   : > { %v1478_v50 = vadd.s32 1, %v3110_v46  ;;  %v1680_v54 = vshrl.u32 %v1679_v49, 23  ;;  %v3662_v7 = vshll.u32 %v1476_v51, 8 }
 0x253   : > { %v1582_v53 = vadd.s32 1, %v3114_v48  ;;  %v3658_v56 = vpop.f32.mrb[4].mxu1  ;;  %v3666_v9 = vshll.u32 %v1580_v52, 8 }
 0x254   : > { %vm1479_vm9 = vcmp.gt.s32.totalorder %v1478_v50, 0  ;;  %v3660_v59 = vpop.f32.mrb[5].mxu1  ;;  %v3118_v60 = vadd.s32 4294967169, %v1680_v54 }
 0x255   : > { %v1480_v4 = vsel %vm1479_vm9, %v1478_v50, 0  ;;  %vm1583_vm10 = vcmp.gt.s32.totalorder %v1582_v53, 0 }
 0x256   : > { %v1481_v5 = vshrl.u32 %v1480_v4, 5  ;;  %v1482_v6 = vand.u32 31, %v1480_v4  ;;  %v1584_v1 = vsel %vm1583_vm10, %v1582_v53, 0  ;;  %v3670_v16 = vadd.s32 1, %v3118_v60 }
 0x257   : > { %v3664_v8 = vshrl.u32 %v1584_v1, 5  ;;  %v1586_v14 = vand.u32 31, %v1584_v1 }
 0x258   : > { %v1483_v11 = vsub.s32 32, %v1482_v6  ;;  %v1485_v13 = vshll.u32 %v3420_v12, %v1482_v6  ;;  %v1488_v18 = vshll.u32 %v3421_v17, %v1482_v6  ;;  %v1491_v20 = vshll.u32 %v3422_v19, %v1482_v6 }
 0x259   : > { %v1494_v22 = vshll.u32 %v3423_v21, %v1482_v6  ;;  %v1497_v24 = vshll.u32 %v3424_v23, %v1482_v6  ;;  %vm1500_vm11 = vcmp.lt.s32.totalorder %v1481_v5, 1  ;;  %vm1501_vm12 = vcmp.lt.s32.totalorder %v1481_v5, 2 }
 0x25a   : > { %v1486_v25 = vshrl.u32 %v3421_v17, %v1483_v11  ;;  %v1489_v26 = vshrl.u32 %v3422_v19, %v1483_v11  ;;  %v1492_v27 = vshrl.u32 %v3423_v21, %v1483_v11  ;;  %v1484_v28 = vshrl.u32 %v3420_v12, %v1483_v11 }
 0x25b   : > { %v1495_v29 = vshrl.u32 %v3424_v23, %v1483_v11  ;;  %v1498_v63 = vshrl.u32 %v3425_v30, %v1483_v11  ;;  %v1587_v34 = vsub.s32 32, %v1586_v14  ;;  %vm1502_vm13 = vcmp.lt.s32.totalorder %v1481_v5, 3 }
 0x25c   : > { %v1487_v31 = vor.u32 %v1486_v25, %v1485_v13  ;;  %v1490_v32 = vor.u32 %v1489_v26, %v1488_v18  ;;  %v1493_v33 = vor.u32 %v1492_v27, %v1491_v20  ;;  %vm1503_vm14 = vcmp.lt.s32.totalorder %v1481_v5, 4 }
 0x25d   : > { %v1496_v35 = vor.u32 %v1495_v29, %v1494_v22  ;;  %v1499_v36 = vor.u32 %v1498_v63, %v1497_v24  ;;  %v1589_v58 = vshll.u32 %v3420_v12, %v1586_v14  ;;  %v1590_v46 = vshrl.u32 %v3421_v17, %v1587_v34 }
 0x25e   : > { %v1504_v37 = vsel %vm1500_vm11, %v1484_v28, %v1487_v31  ;;  %v1505_v38 = vsel %vm1503_vm14, %v1493_v33, 2102212464  ;;  %v1508_v39 = vsel %vm1500_vm11, %v1487_v31, %v1490_v32  ;;  %v1512_v40 = vsel %vm1500_vm11, %v1490_v32, %v1493_v33 }
 0x25f   : > { %v1506_v62 = vsel %vm1502_vm13, %v1490_v32, %v1505_v38  ;;  %v1509_v42 = vsel %vm1503_vm14, %v1496_v35, 920167782  ;;  %v1513_v43 = vsel %vm1503_vm14, %v1499_v36, 1326507024  ;;  %v1592_v48 = vshll.u32 %v3421_v17, %v1586_v14 }
 0x260   : > { %v1510_v44 = vsel %vm1502_vm13, %v1493_v33, %v1509_v42  ;;  %v1514_v15 = vsel %vm1502_vm13, %v1496_v35, %v1513_v43  ;;  %v1507_v49 = vsel %vm1501_vm12, %v1504_v37, %v1506_v62  ;;  %v1593_v52 = vshrl.u32 %v3422_v19, %v1587_v34 }
 0x261   : > { %v1511_v50 = vsel %vm1501_vm12, %v1508_v39, %v1510_v44  ;;  %v1515_v51 = vsel %vm1501_vm12, %v1512_v40, %v1514_v15  ;;  %v1591_v6 = vor.u32 %v1590_v46, %v1589_v58  ;;  %v1595_v11 = vshll.u32 %v3422_v19, %v1586_v14 }
 0x262   : > { %v3693_v53 = vmul.u32.u64.low %v3662_v7, %v1515_v51  ;;  %v3694_v54 = vmul.u32.u64.high %v3662_v7, %v1515_v51, %v3693_v53  ;;  %v3697_v4 = vmul.u32.u64.low %v3662_v7, %v1511_v50  ;;  %v3698_v60 = vmul.u32.u64.high %v3662_v7, %v1511_v50, %v3697_v4 }
 0x263   : > { %v1594_v1 = vor.u32 %v1593_v52, %v1592_v48  ;;  %v1596_v13 = vshrl.u32 %v3423_v21, %v1587_v34  ;;  %v1588_v5 = vshrl.u32 %v3420_v12, %v1587_v34  ;;  %v1598_v18 = vshll.u32 %v3423_v21, %v1586_v14 }
 0x264   : > { %v1599_v20 = vshrl.u32 %v3424_v23, %v1587_v34  ;;  %v1602_v22 = vshrl.u32 %v3425_v30, %v1587_v34  ;;  %v1523_v24 = vmul.u32 %v3662_v7, %v1507_v49  ;;  %v1601_v26 = vshll.u32 %v3424_v23, %v1586_v14 }
 0x265   : > { %v1597_v25 = vor.u32 %v1596_v13, %v1595_v11  ;;  %vm1604_vm15 = vcmp.lt.s32.totalorder %v3664_v8, 1  ;;  %vm1525_vm0 = vc.u32 %v3694_v54, %v3697_v4  ;;  %v1526_v27 = vadd.s32 1, %v3698_v60 }
 0x266   : > { %v1600_v28 = vor.u32 %v1599_v20, %v1598_v18  ;;  %vm1605_vm9 = vcmp.lt.s32.totalorder %v3664_v8, 2  ;;  %v1603_v29 = vor.u32 %v1602_v22, %v1601_v26  ;;  %vm1606_vm10 = vcmp.lt.s32.totalorder %v3664_v8, 3 }
 0x267   : > { %vm1607_vm11 = vcmp.lt.s32.totalorder %v3664_v8, 4  ;;  %v1612_v63 = vsel %vm1604_vm15, %v1591_v6, %v1594_v1  ;;  %v1527_v7 = vsel %vm1525_vm0, %v1526_v27, %v3698_v60  ;;  %v1616_v32 = vsel %vm1604_vm15, %v1594_v1, %v1597_v25 }
 0x268   : > { %v1609_v31 = vsel %vm1607_vm11, %v1597_v25, 2102212464  ;;  %v1613_v14 = vsel %vm1607_vm11, %v1600_v28, 920167782  ;;  %v1528_v33 = vadd.s32 %v1527_v7, %v1523_v24  ;;  %v1608_v34 = vsel %vm1604_vm15, %v1588_v5, %v1591_v6 }
 0x269   : > { %v1614_v35 = vsel %vm1606_vm10, %v1597_v25, %v1613_v14  ;;  %v1617_v36 = vsel %vm1607_vm11, %v1603_v29, 1326507024  ;;  %v1610_v37 = vsel %vm1606_vm10, %v1594_v1, %v1609_v31  ;;  %vm1687_vm12 = vcmp.gt.s32.totalorder %v3670_v16, 0 }
 0x26a   : > { %v1615_v38 = vsel %vm1605_vm9, %v1612_v63, %v1614_v35  ;;  %v1618_v39 = vsel %vm1606_vm10, %v1600_v28, %v1617_v36  ;;  %v1529_v40 = vadd.s32 536870912, %v1528_v33  ;;  %v1688_v15 = vsel %vm1687_vm12, %v3670_v16, 0 }
 0x26b   : > { %v1619_v62 = vsel %vm1605_vm9, %v1616_v32, %v1618_v39  ;;  %v3723_v42 = vmul.u32.u64.low %v3666_v9, %v1615_v38  ;;  %v3724_v43 = vmul.u32.u64.high %v3666_v9, %v1615_v38, %v3723_v42  ;;  %v1611_v48 = vsel %vm1605_vm9, %v1608_v34, %v1610_v37 }
 0x26c   : > { %v3728_v58 = vmul.u32.u64.low %v3666_v9, %v1619_v62  ;;  %v3729_v44 = vmul.u32.u64.high %v3666_v9, %v1619_v62, %v3728_v58  ;;  %v3732_v46 = vshrl.u32 %v1529_v40, 30  ;;  %v1690_v49 = vand.u32 31, %v1688_v15 }
 0x26d   : > { %v1683_v50 = vand.u32 8388607, %v1676_v10  ;;  %v1630_v52 = vadd.s32 1, %v3724_v43  ;;  %v1627_v60 = vmul.u32 %v3666_v9, %v1611_v48  ;;  %v1782_v22 = vand.u32 2139095040, %v3655_v47 }
 0x26e   : > { %v1531_v51 = vshll.u32 %v3732_v46, 30  ;;  %v1691_v53 = vsub.s32 32, %v1690_v49  ;;  %vm1629_vm13 = vc.u32 %v3729_v44, %v3723_v42  ;;  %v1699_v18 = vshll.u32 %v3422_v19, %v1690_v49 }
 0x26f   : > { %v1631_v6 = vsel %vm1629_vm13, %v1630_v52, %v3724_v43  ;;  %v1684_v8 = vor.u32 8388608, %v1683_v50  ;;  %v1689_v24 = vshrl.u32 %v1688_v15, 5  ;;  %v1693_v25 = vshll.u32 %v3420_v12, %v1690_v49 }
 0x270   : > { %v1532_v16 = vsub.s32 %v1528_v33, %v1531_v51  ;;  %v1632_v1 = vadd.s32 %v1631_v6, %v1627_v60  ;;  %v1694_v11 = vshrl.u32 %v3421_v17, %v1691_v53  ;;  %v1697_v13 = vshrl.u32 %v3422_v19, %v1691_v53 }
 0x271   : > { %v1700_v20 = vshrl.u32 %v3423_v21, %v1691_v53  ;;  %v1696_v26 = vshll.u32 %v3421_v17, %v1690_v49  ;;  %v1702_v29 = vshll.u32 %v3423_v21, %v1690_v49  ;;  %v1703_v63 = vshrl.u32 %v3424_v23, %v1691_v53 }
 0x272   : > { %v1534_v5 = vsub.s32 0, %v1532_v16  ;;  %v1633_v9 = vadd.s32 536870912, %v1632_v1  ;;  %v1695_v31 = vor.u32 %v1694_v11, %v1693_v25  ;;  %v1706_v32 = vshrl.u32 %v3425_v30, %v1691_v53 }
 0x273   : > { %v1701_v28 = vor.u32 %v1700_v20, %v1699_v18  ;;  %v1698_v14 = vor.u32 %v1697_v13, %v1696_v26  ;;  %v1704_v34 = vor.u32 %v1703_v63, %v1702_v29  ;;  %v1724_v35 = vshll.u32 %v1684_v8, 8 }
 0x274   : > { %v3111_v27 = vmin.u32 %v1534_v5, %v1532_v16  ;;  %v3753_v7 = vshrl.u32 %v1633_v9, 30  ;;  %v1783_v36 = vshrl.u32 %v1782_v22, 23  ;;  %v1692_v38 = vshrl.u32 %v3420_v12, %v1691_v53 }
 0x275   : > { %v1705_v39 = vshll.u32 %v3424_v23, %v1690_v49  ;;  %vm1711_vm14 = vcmp.lt.s32.totalorder %v1689_v24, 4  ;;  %vm1708_vm15 = vcmp.lt.s32.totalorder %v1689_v24, 1  ;;  %vm1710_vm0 = vcmp.lt.s32.totalorder %v1689_v24, 3 }
 0x276   : > { %v1536_v33 = vclz %v3111_v27  ;;  %v1635_v37 = vshll.u32 %v3753_v7, 30  ;;  %v1713_v62 = vsel %vm1711_vm14, %v1701_v28, 2102212464  ;;  %v1716_v15 = vsel %vm1708_vm15, %v1695_v31, %v1698_v14 }
 0x277   : > { %v1707_v58 = vor.u32 %v1706_v32, %v1705_v39  ;;  %v1717_v48 = vsel %vm1711_vm14, %v1704_v34, 920167782  ;;  %v1712_v50 = vsel %vm1708_vm15, %v1692_v38, %v1695_v31  ;;  %v1714_v51 = vsel %vm1710_vm0, %v1698_v14, %v1713_v62 }
 0x278   : > { %v3112_v40 = vadd.s32 4294967294, %v1536_v33  ;;  %v3760_v43 = vsub.s32 %v1632_v1, %v1635_v37  ;;  %v1718_v49 = vsel %vm1710_vm0, %v1701_v28, %v1717_v48  ;;  %v1524_v52 = vadd.s32 %v3697_v4, %v3694_v54 }
 0x279   : > { %vm1709_vm10 = vcmp.lt.s32.totalorder %v1689_v24, 2  ;;  %v1720_v11 = vsel %vm1708_vm15, %v1698_v14, %v1701_v28  ;;  %v1721_v20 = vsel %vm1711_vm14, %v1707_v58, 1326507024  ;;  %v3122_v54 = vadd.s32 4294967169, %v1783_v36 }
 0x27a   : > { %vm3113_vm9 = vcmp.lt.s32.totalorder %v3112_v40, 0  ;;  %v1638_v60 = vsub.s32 0, %v3760_v43  ;;  %v1719_v8 = vsel %vm1709_vm10, %v1716_v15, %v1718_v49  ;;  %v1715_v18 = vsel %vm1709_vm10, %v1712_v50, %v1714_v51 }
 0x27b   : > { %v1539_v53 = vsel %vm3113_vm9, 0, %v3112_v40  ;;  %v1722_v25 = vsel %vm1710_vm0, %v1704_v34, %v1721_v20  ;;  %v3774_v27 = vmul.u32.u64.low %v1724_v35, %v1719_v8  ;;  %v3775_v29 = vmul.u32.u64.high %v1724_v35, %v1719_v8, %v3774_v27 }
 0x27c   : > { %v1540_v6 = vsub.s32 32, %v1539_v53  ;;  %v1544_v1 = vsub.s32 4294967266, %v1539_v53  ;;  %v1541_v13 = vshll.u32 %v1532_v16, %v1539_v53  ;;  %v3115_v5 = vmin.u32 %v1638_v60, %v3760_v43 }
 0x27d   : > { %v1723_v26 = vsel %vm1709_vm10, %v1720_v11, %v1722_v25  ;;  %v1789_v32 = vadd.s32 1, %v3122_v54  ;;  %v1779_v37 = vand.u32 2147483647, %v3655_v47  ;;  %v1731_v24 = vmul.u32 %v1724_v35, %v1715_v18 }
 0x27e   : > { %v1542_v22 = vshrl.u32 %v1524_v52, %v1540_v6  ;;  %v1545_v9 = vadd.s32 127, %v1544_v1  ;;  %v1640_v4 = vclz %v3115_v5  ;;  %v1734_v34 = vadd.s32 1, %v3775_v29 }
 0x27f   : > { %v3778_v28 = vmul.u32.u64.low %v1724_v35, %v1723_v26  ;;  %v3779_v16 = vmul.u32.u64.high %v1724_v35, %v1723_v26, %v3778_v28  ;;  %vm1790_vm12 = vcmp.gt.s32.totalorder %v1789_v32, 0  ;;  %v1786_v35 = vand.u32 8388607, %v1779_v37 }
 0x280   : > { %v1543_v63 = vor.u32 %v1542_v22, %v1541_v13  ;;  %v1546_v31 = vshll.u32 %v1545_v9, 23  ;;  %v3116_v14 = vadd.s32 4294967294, %v1640_v4  ;;  %v1791_v48 = vsel %vm1790_vm12, %v1789_v32, 0 }
 0x281   : > { %vm1733_vm13 = vc.u32 %v3779_v16, %v3774_v27  ;;  %v1793_v50 = vand.u32 31, %v1791_v48  ;;  %v1554_v51 = vsub.s32 4, %v3732_v46  ;;  %vm3796_vm14 = vcmp.le.f32.partialorder %v1468_v61, 0.7853982 }
 0x282   : > { %v1547_v33 = vor.u32 4788187, %v1546_v31  ;;  %vm3117_vm11 = vcmp.lt.s32.totalorder %v3116_v14, 0  ;;  %v1550_v38 = vcvt.s32.f32 %v1543_v63  ;;  %v1735_v62 = vsel %vm1733_vm13, %v1734_v34, %v3775_v29 }
 0x283   : > { %v3783_v39 = vsel %vm3117_vm11, 0, %v3116_v14  ;;  %v1736_v15 = vadd.s32 %v1735_v62, %v1731_v24  ;;  %v1794_v53 = vsub.s32 32, %v1793_v50  ;;  %vm1470_vm15 = vcmp.lt.s32.totalorder %v3641_v57, 0 }
 0x284   : > { %v1548_v36 = vand.u32 2147483647, %v1547_v33  ;;  %v1648_v40 = vsub.s32 4294967266, %v3783_v39  ;;  %v1628_v8 = vadd.s32 %v3723_v42, %v3729_v44  ;;  %v1787_v11 = vor.u32 8388608, %v1786_v35 }
 0x285   : > { %v1737_v49 = vadd.s32 536870912, %v1736_v15  ;;  %v3804_v13 = vsel %vm1470_vm15, %v1554_v51, %v3732_v46  ;;  %v1644_v5 = vsub.s32 32, %v3783_v39  ;;  %v1797_v20 = vshrl.u32 %v3421_v17, %v1794_v53 }
 0x286   : > { %v1551_v58 = vmul.f32 %v1550_v38, %v1548_v36  ;;  %v1649_v52 = vadd.s32 127, %v1648_v40  ;;  %v1796_v61 = vshll.u32 %v3420_v12, %v1793_v50  ;;  %v1800_v9 = vshrl.u32 %v3422_v19, %v1794_v53 }
 0x287   : > { %v3792_v6 = vshrl.u32 %v1737_v49, 30  ;;  %v1803_v25 = vshrl.u32 %v3423_v21, %v1794_v53  ;;  %v1799_v42 = vshll.u32 %v3421_v17, %v1793_v50  ;;  %v1802_v44 = vshll.u32 %v3422_v19, %v1793_v50 }
 0x288   : > { %v1552_v60 = vxor.u32 2147483648, %v1551_v58  ;;  %v1650_v22 = vshll.u32 %v1649_v52, 23  ;;  %v1792_v46 = vshrl.u32 %v1791_v48, 5  ;;  %v1798_v26 = vor.u32 %v1797_v20, %v1796_v61 }
 0x289   : > { %v1739_v18 = vshll.u32 %v3792_v6, 30  ;;  %v1805_v29 = vshll.u32 %v3423_v21, %v1793_v50  ;;  %v1827_v63 = vshll.u32 %v1787_v11, 8  ;;  %v1801_v28 = vor.u32 %v1800_v9, %v1799_v42 }
 0x28a   : > { %v1553_v54 = vsel %vm1470_vm15, %v1552_v60, %v1551_v58  ;;  %v1804_v14 = vor.u32 %v1803_v25, %v1802_v44  ;;  %v1806_v32 = vshrl.u32 %v3424_v23, %v1794_v53  ;;  %v1645_v24 = vshll.u32 %v3760_v43, %v3783_v39 }
 0x28b   : > { %v1740_v4 = vsub.s32 %v1736_v15, %v1739_v18  ;;  %v1556_v33 = vsel %vm3796_vm14, %v3641_v57, %v1553_v54  ;;  %v1808_v17 = vshll.u32 %v3424_v23, %v1793_v50  ;;  %v1809_v19 = vshrl.u32 %v3425_v30, %v1794_v53 }
 0x28c   : > { %v1646_v34 = vshrl.u32 %v1628_v8, %v1644_v5  ;;  %v1651_v36 = vor.u32 4788187, %v1650_v22  ;;  %v1807_v38 = vor.u32 %v1806_v32, %v1805_v29  ;;  %v1795_v40 = vshrl.u32 %v3420_v12, %v1794_v53 }
 0x28d   : > { %v1742_v31 = vsub.s32 0, %v1740_v4  ;;  %v1810_v62 = vor.u32 %v1809_v19, %v1808_v17  ;;  %vm1811_vm0 = vcmp.lt.s32.totalorder %v1792_v46, 1  ;;  %vm1814_vm9 = vcmp.lt.s32.totalorder %v1792_v46, 4 }
 0x28e   : > { %3327 = vcosq.f32 %v1556_v33  ;;  %v1816_v15 = vsel %vm1814_vm9, %v1804_v14, 2102212464  ;;  %v1819_v48 = vsel %vm1811_vm0, %v1798_v26, %v1801_v28  ;;  %vm1813_vm10 = vcmp.lt.s32.totalorder %v1792_v46, 3 }
 0x28f   : > { %v3119_v21 = vmin.u32 %v1742_v31, %v1740_v4  ;;  %3329 = vsinq.f32 %v1556_v33  ;;  %v1820_v43 = vsel %vm1814_vm9, %v1807_v38, 920167782  ;;  %v1823_v39 = vsel %vm1811_vm0, %v1801_v28, %v1804_v14 }
 0x290   : > { %vm1812_vm11 = vcmp.lt.s32.totalorder %v1792_v46, 2  ;;  %v1821_v30 = vsel %vm1813_vm10, %v1804_v14, %v1820_v43  ;;  %v1824_v35 = vsel %vm1814_vm9, %v1810_v62, 1326507024  ;;  %v1815_v50 = vsel %vm1811_vm0, %v1795_v40, %v1798_v26 }
 0x291   : > { %v1744_v58 = vclz %v3119_v21  ;;  %v1817_v51 = vsel %vm1813_vm10, %v1801_v28, %v1816_v15  ;;  %v1822_v49 = vsel %vm1812_vm11, %v1819_v48, %v1821_v30  ;;  %v1825_v12 = vsel %vm1813_vm10, %v1807_v38, %v1824_v35 }
 0x292   : > { %v1826_v52 = vsel %vm1812_vm11, %v1823_v39, %v1825_v12  ;;  %v3826_v53 = vmul.u32.u64.low %v1827_v63, %v1822_v49  ;;  %v3827_v60 = vmul.u32.u64.high %v1827_v63, %v1822_v49, %v3826_v53  ;;  %v1732_v8 = vadd.s32 %v3774_v27, %v3779_v16 }
 0x293   : > { %v3120_v23 = vadd.s32 4294967294, %v1744_v58  ;;  %v3832_v5 = vmul.u32.u64.low %v1827_v63, %v1826_v52  ;;  %v3833_v18 = vmul.u32.u64.high %v1827_v63, %v1826_v52, %v3832_v5  ;;  %v1647_v20 = vor.u32 %v1646_v34, %v1645_v24 }
 0x294   : > { %v1818_v9 = vsel %vm1812_vm11, %v1815_v50, %v1817_v51  ;;  %v1557_v25 = vsel %vm3796_vm14, 0, %v3804_v13  ;;  %v1652_v54 = vand.u32 2147483647, %v1651_v36  ;;  %v1837_v29 = vadd.s32 1, %v3827_v60 }
 0x295   : > { %vm3121_vm12 = vcmp.lt.s32.totalorder %v3120_v23, 0  ;;  %v1834_v27 = vmul.u32 %v1827_v63, %v1818_v9  ;;  %vm1836_vm13 = vc.u32 %v3833_v18, %v3826_v53  ;;  %v1654_v31 = vcvt.s32.f32 %v1647_v20 }
 0x296   : > { %v1747_v11 = vsel %vm3121_vm12, 0, %v3120_v23  ;;  %v1838_v46 = vsel %vm1836_vm13, %v1837_v29, %v3827_v60  ;;  %v1561_v33 = vadd.s32 3, %v1557_v25  ;;  %vm1574_vm14 = vcmp.lt.s32.totalorder %v3645_v41, 0 }
 0x297   : > { %v1748_v22 = vsub.s32 32, %v1747_v11  ;;  %v1752_v61 = vsub.s32 4294967266, %v1747_v11  ;;  %v1749_v42 = vshll.u32 %v1740_v4, %v1747_v11  ;;  %v1839_v1 = vadd.s32 %v1838_v46, %v1834_v27 }
 0x298   : > { %v3328_v16 = vpop.eup %3327  ;;  %v1655_v13 = vmul.f32 %v1654_v31, %v1652_v54  ;;  %v1562_v34 = vand.u32 3, %v1561_v33  ;;  %vm3849_vm15 = vcmp.le.f32.partialorder %v1676_v10, 0.7853982  ;;  %vm1678_vm0 = vcmp.lt.s32.totalorder %v3653_v45, 0 }
 0x299   : > { %v1750_v44 = vshrl.u32 %v1732_v8, %v1748_v22  ;;  %v1753_v26 = vadd.s32 127, %v1752_v61  ;;  %v3330_v32 = vpop.eup %3329  ;;  %v1840_v4 = vadd.s32 536870912, %v1839_v1  ;;  %v1568_v40 = vxor.u32 2147483648, %v3328_v16 }
 0x29a   : > { %v1656_v63 = vxor.u32 2147483648, %v1655_v13  ;;  %v1565_v38 = vxor.u32 2147483648, %v3330_v32  ;;  %v1762_v48 = vsub.s32 4, %v3792_v6  ;;  %vm1564_vm9 = vcmp.eq.s32.totalorder %v1562_v34, 0 }
 0x29b   : > { %v1751_v28 = vor.u32 %v1750_v44, %v1749_v42  ;;  %v1754_v14 = vshll.u32 %v1753_v26, 23  ;;  %v3843_v36 = vshrl.u32 %v1840_v4, 30  ;;  %vm1567_vm10 = vcmp.eq.s32.totalorder %v1562_v34, 2 }
 0x29c   : > { %v1657_v39 = vsel %vm1574_vm14, %v1656_v63, %v1655_v13  ;;  %v1566_v30 = vsel %vm1564_vm9, %v3328_v16, %v1565_v38  ;;  %v1569_v35 = vsel %vm1567_vm10, %v1568_v40, %v3330_v32  ;;  %vm3864_vm11 = vcmp.le.f32.partialorder %v1572_v55, 0.7853982 }
 0x29d   : > { %v1755_v24 = vor.u32 4788187, %v1754_v14  ;;  %v1758_v19 = vcvt.s32.f32 %v1751_v28  ;;  %v1842_v62 = vshll.u32 %v3843_v36, 30  ;;  %vm1563_vm12 = vcmp.lt.s32.totalorder %v1562_v34, 2 }
 0x29e   : > { %v1660_v49 = vsel %vm3864_vm11, %v3645_v41, %v1657_v39  ;;  %v1570_v52 = vsel %vm1563_vm12, %v1566_v30, %v1569_v35  ;;  %v1658_v60 = vsub.s32 4, %v3753_v7  ;;  %v1763_v8 = vsel %vm1678_vm0, %v1762_v48, %v3792_v6 }
 0x29f   : > { %v1756_v17 = vand.u32 2147483647, %v1755_v24  ;;  %v1843_v43 = vsub.s32 %v1839_v1, %v1842_v62  ;;  %vm1560_vm13 = vweird.f32 %v3641_v57  ;;  %v1765_v5 = vsel %vm3849_vm15, 0, %v1763_v8 }
 0x2a0   : > { %v1571_v11 = vsel %vm1560_vm13, nan, %v1570_v52  ;;  %v1659_v22 = vsel %vm1574_vm14, %v1658_v60, %v3753_v7  ;;  %v1769_v61 = vand.u32 3, %v1765_v5  ;;  %v1884_v25 = vmul.f32 %v3658_v56, %v3658_v56 }
 0x2a1   : > { %v1759_v21 = vmul.f32 %v1758_v19, %v1756_v17  ;;  %v1845_v50 = vsub.s32 0, %v1843_v43  ;;  %v1896_v6 = vsel %vm300_vm4, %v3641_v57, %v1571_v11  ;;  %v1661_v54 = vsel %vm3864_vm11, 0, %v1659_v22 }
 0x2a2   : > { %v1835_v42 = vadd.s32 %v3826_v53, %v3833_v18  ;;  %v1885_v29 = vmul.f32 %v3660_v59, %v3660_v59  ;;  %v1908_v27 = vand.u32 4294901760, %v1896_v6  ;;  %v1665_v46 = vadd.s32 3, %v1661_v54 }
 0x2a3   : > { %v1760_v15 = vxor.u32 2147483648, %v1759_v21  ;;  %v3123_v12 = vmin.u32 %v1845_v50, %v1843_v43  ;;  %v1886_v32 = vsub.f32 0.0, %v1884_v25  ;;  %vm1774_vm14 = vcmp.eq.s32.totalorder %v1769_v61, 2 }
 0x2a4   : > { %v3892_v4 = vsub.f32 %v1896_v6, %v1908_v27  ;;  %vm1768_vm10 = vweird.f32 %v3653_v45  ;;  %v1887_v34 = vsub.f32 0.0, %v1885_v29  ;;  %v1666_v38 = vand.u32 3, %v1665_v46 }
 0x2a5   : > { %v1761_v23 = vsel %vm1678_vm0, %v1760_v15, %v1759_v21  ;;  %v1847_v55 = vclz %v3123_v12  ;;  %vm1770_vm0 = vcmp.lt.s32.totalorder %v1769_v61, 2  ;;  %v1888_v40 = vmul.f32 1.442695, %v1886_v32 }
 0x2a6   : > { %v1764_v10 = vsel %vm3849_vm15, %v3653_v45, %v1761_v23  ;;  %vm1771_vm15 = vcmp.eq.s32.totalorder %v1769_v61, 0  ;;  %vm1781_vm11 = vcmp.lt.s32.totalorder %v3655_v47, 0  ;;  %v1996_v30 = vand.u32 4294901760, %v3892_v4 }
 0x2a7   : > { %3331 = vcosq.f32 %v1764_v10  ;;  %v3124_v20 = vadd.s32 4294967294, %v1847_v55  ;;  %vm3900_vm12 = vcmp.le.f32.partialorder %v1779_v37, 0.7853982  ;;  %v1890_v50 = vmul.f32 1.442695, %v1887_v34 }
 0x2a8   : > { %3333 = vsinq.f32 %v1764_v10  ;;  %v1892_v10 = vmul.f32 1.442695, %v3658_v56  ;;  %v1894_v51 = vmul.f32 1.442695, %v3660_v59  ;;  %vm1671_vm13 = vcmp.eq.s32.totalorder %v1666_v38, 2 }
 0x2a9   : > { %3335 = vcosq.f32 %v1660_v49  ;;  %vm3125_vm9 = vcmp.lt.s32.totalorder %v3124_v20, 0  ;;  %v1997_v37 = vsub.f32 %v3892_v4, %v1996_v30  ;;  %v1865_v11 = vsub.s32 4, %v3843_v36 }
 0x2aa   : > { %3337 = vsinq.f32 %v1660_v49  ;;  %v1850_v9 = vsel %vm3125_vm9, 0, %v3124_v20  ;;  %vm1668_vm9 = vcmp.eq.s32.totalorder %v1666_v38, 0 }
 0x2ab   : > { %3339 = vtanh.f32 %v3653_v45  ;;  %v1851_v44 = vsub.s32 32, %v1850_v9  ;;  %v1855_v26 = vsub.s32 4294967266, %v1850_v9  ;;  %v1852_v57 = vshll.u32 %v1843_v43, %v1850_v9 }
 0x2ac   : > { %3341 = vpow2.f32 %v1888_v40  ;;  %v1998_v61 = vand.u32 4294901760, %v1997_v37  ;;  %v1866_v25 = vsel %vm1781_vm11, %v1865_v11, %v3843_v36  ;;  %v231_v36 = vld [vmem:[%s4055_s3] sm:$0xff] }
 0x2ad   : > { %v1853_v31 = vshrl.u32 %v1835_v42, %v1851_v44  ;;  %v1856_v28 = vadd.s32 127, %v1855_v26  ;;  %3343 = vpow2.f32 %v1890_v50  ;;  %v1868_v44 = vsel %vm3900_vm12, 0, %v1866_v25 }
 0x2ae   : > { %3345 = vpow2.f32 %v1894_v51 }
 0x2af   : > { %v1854_v1 = vor.u32 %v1853_v31, %v1852_v57  ;;  %v1857_v13 = vshll.u32 %v1856_v28, 23 }
 0x2b1   : > { %v3332_v7 = vpop.eup %3331  ;;  %v1858_v19 = vor.u32 4788187, %v1857_v13  ;;  %v1861_v15 = vcvt.s32.f32 %v1854_v1 }
 0x2b2   : > { %v3334_v16 = vpop.eup %3333  ;;  %v1775_v14 = vxor.u32 2147483648, %v3332_v7 }
 0x2b3   : > { %v1772_v33 = vxor.u32 2147483648, %v3334_v16  ;;  %v3336_v18 = vpop.eup %3335  ;;  %v1859_v58 = vand.u32 2147483647, %v1858_v19 }
 0x2b4   : > { %v1776_v53 = vsel %vm1774_vm14, %v1775_v14, %v3334_v16  ;;  %v3338_v17 = vpop.eup %3337  ;;  %v1672_v48 = vxor.u32 2147483648, %v3336_v18  ;;  %vm1667_vm14 = vcmp.lt.s32.totalorder %v1666_v38, 2 }
 0x2b5   : > { %v1773_v24 = vsel %vm1771_vm15, %v3332_v7, %v1772_v33  ;;  %v3340_v21 = vpop.eup %3339  ;;  %v1669_v39 = vxor.u32 2147483648, %v3338_v17  ;;  %v1862_v35 = vmul.f32 %v1861_v15, %v1859_v58  ;;  %vm1664_vm15 = vweird.f32 %v3645_v41 }
 0x2b6   : > { %v1777_v63 = vsel %vm1770_vm0, %v1773_v24, %v1776_v53  ;;  %v1673_v60 = vsel %vm1671_vm13, %v1672_v48, %v3338_v17  ;;  %v3342_v26 = vpop.eup %3341  ;;  %vm1902_vm0 = vcmask 195584   ;;  %vm1871_vm13 = vweird.f32 %v3655_v47 }
 0x2b7   : > { %v1778_v62 = vsel %vm1768_vm10, nan, %v1777_v63  ;;  %v1863_v52 = vxor.u32 2147483648, %v1862_v35  ;;  %v1670_v8 = vsel %vm1668_vm9, %v3336_v18, %v1669_v39  ;;  %v3344_v29 = vpop.eup %3343  ;;  %v1904_v32 = vsel %vm1902_vm0, %v231_v36, 0 }
 0x2b8   : > { %v1898_v43 = vsel %vm300_vm4, %v1778_v62, %v3340_v21  ;;  %v1674_v6 = vsel %vm1667_vm14, %v1670_v8, %v1673_v60  ;;  %v3346_v16 = vpop.eup %3345  ;;  %v3937_v17 = vand.u32 4294901760, %v1904_v32 }
 0x2b9   : > { %v1912_v23 = vand.u32 4294901760, %v1898_v43  ;;  %v1864_v59 = vsel %vm1781_vm11, %v1863_v52, %v1862_v35  ;;  %v1675_v54 = vsel %vm1664_vm15, nan, %v1674_v6  ;;  %v1901_v46 = vsel %vm300_vm4, %v3344_v29, %v3346_v16 }
 0x2ba   : > { %v1867_v5 = vsel %vm3900_vm12, %v3655_v47, %v1864_v59  ;;  %v1897_v7 = vsel %vm300_vm4, %v3645_v41, %v1675_v54  ;;  %v1914_v24 = vand.u32 4294901760, %v1901_v46  ;;  %v1978_v21 = vsub.f32 %v1904_v32, %v3937_v17 }
 0x2bb   : > { %v3906_v49 = vpack.c.bf16 %v1912_v23, %v1908_v27  ;;  %v3908_v12 = vsub.f32 %v1898_v43, %v1912_v23  ;;  %3347 = vcosq.f32 %v1867_v5  ;;  %v1872_v27 = vand.u32 3, %v1868_v44 }
 0x2bc   : > { %3349 = vsinq.f32 %v1867_v5  ;;  %v1906_v57 = vand.u32 4294901760, %v1897_v7  ;;  %v2013_v15 = vsub.f32 %v1901_v46, %v1914_v24  ;;  %v1979_v48 = vand.u32 4294901760, %v1978_v21 }
 0x2bd   : > { %v2008_v55 = vand.u32 4294901760, %v3908_v12  ;;  %v3166_v56 = vpack.c.bf16 %v3908_v12, %v3892_v4  ;;  %3351 = vpow2.f32 %v1892_v10  ;;  %vm1877_vm10 = vcmp.eq.s32.totalorder %v1872_v27, 2 }
 0x2be   : > { %3353 = vtanh.f32 %v3655_v47  ;;  %vm1874_vm11 = vcmp.eq.s32.totalorder %v1872_v27, 0  ;;  %v1989_v13 = vsub.f32 %v1897_v7, %v1906_v57  ;;  %vm1873_vm12 = vcmp.lt.s32.totalorder %v1872_v27, 2 }
 0x2bf   : > { %v2009_v20 = vsub.f32 %v3908_v12, %v2008_v55  ;;  %v3921_v22 = vpack.c.bf16 %v2008_v55, %v1996_v30  ;;  %v1980_v23 = vsub.f32 %v1978_v21, %v1979_v48  ;;  %v2014_v47 = vand.u32 4294901760, %v2013_v15 }
 0x2c0   : > { %v1990_v58 = vand.u32 4294901760, %v1989_v13 }
 0x2c1   : > { %v2010_v9 = vand.u32 4294901760, %v2009_v20  ;;  %v1981_v52 = vand.u32 4294901760, %v1980_v23  ;;  %v2015_v55 = vsub.f32 %v2013_v15, %v2014_v47 }
 0x2c2   : > { %v1991_v45 = vsub.f32 %v1989_v13, %v1990_v58 }
 0x2c3   : > { %v3162_v42 = vpack.c.bf16 %v2010_v9, %v1998_v61  ;;  %v2016_v5 = vand.u32 4294901760, %v2015_v55 }
 0x2c4   : > { %v1992_v8 = vand.u32 4294901760, %v1991_v45 }
 0x2c5   : > { %v3348_v31 = vpop.eup %3347 }
 0x2c6   : > { %v3350_v28 = vpop.eup %3349  ;;  %v1878_v14 = vxor.u32 2147483648, %v3348_v31 }
 0x2c7   : > { %v3352_v33 = vpop.eup %3351  ;;  %v1875_v1 = vxor.u32 2147483648, %v3350_v28 }
 0x2c8   : > { %v1879_v41 = vsel %vm1877_vm10, %v1878_v14, %v3350_v28  ;;  %v1900_v53 = vsel %vm300_vm4, %v3342_v26, %v3352_v33  ;;  %v3354_v34 = vpop.eup %3353 }
 0x2c9   : > { %v1876_v18 = vsel %vm1874_vm11, %v3348_v31, %v1875_v1  ;;  %v1916_v40 = vand.u32 4294901760, %v1900_v53 }
 0x2ca   : > { %v1880_v19 = vsel %vm1873_vm12, %v1876_v18, %v1879_v41 }
 0x2cb   : > { %v1881_v63 = vsel %vm1871_vm13, nan, %v1880_v19  ;;  %v2019_v30 = vsub.f32 %v1900_v53, %v1916_v40 }
 0x2cc   : > { %v1899_v38 = vsel %vm300_vm4, %v1881_v63, %v3354_v34 }
 0x2cd   : > { %v1910_v62 = vand.u32 4294901760, %v1899_v38  ;;  %v2020_v60 = vand.u32 4294901760, %v2019_v30 }
 0x2cf   : > { %v3156_v43 = vpack.c.bf16 %v1910_v62, %v1906_v57  ;;  %v2001_v39 = vsub.f32 %v1899_v38, %v1910_v62  ;;  %v2021_v11 = vsub.f32 %v2019_v30, %v2020_v60 }
 0x2d1   : > { %3157 = vmatprep.subr.bf16.mxu1 %v3156_v43  ;;  %v2002_v35 = vand.u32 4294901760, %v2001_v39  ;;  %v3164_v10 = vpack.c.bf16 %v2001_v39, %v1989_v13  ;;  %v2022_v20 = vand.u32 4294901760, %v2021_v11 }
 0x2d2   : > { %3159 = vmatpush1.bf16.msra.mxu1 %v3906_v49 }
 0x2d3   : > { %1915 = vmatprep.subr.mxu1 %v1914_v24  ;;  %v2003_v50 = vsub.f32 %v2001_v39, %v2002_v35  ;;  %v3172_v51 = vpack.c.bf16 %v2002_v35, %v1990_v58 }
 0x2d5   : > { %v2004_v37 = vand.u32 4294901760, %v2003_v50 }
 0x2d6   : > { %1917 = vmatpush1.msra.mxu1 %v1916_v40 }
 0x2d7   : > { %v3160_v59 = vpack.c.bf16 %v2004_v37, %v1992_v8  ;;  %1982 = vmatmul.mubr.f32.vlgmr.msra.gmra.mrb[6].mxu1 %v1981_v52 }
 0x2d9   : > { %3161 = vmatprep.subr.bf16.mxu0 %v3160_v59 }
 0x2da   : > { %3163 = vmatpush1.bf16.msra.mxu0 %v3162_v42 }
 0x2db   : > { %2017 = vmatprep.subr.mxu0 %v2016_v5 }
 0x2de   : > { %2023 = vmatpush1.msra.mxu0 %v2022_v20 }
 0x2df   : > { %2084 = vmatmul.mubr.f32.vlgmr.msra.gmra.mrb[2].mxu0 %v3937_v17  ;;  %3165 = vmatprep.subr.bf16.mxu0 %v3164_v10 }
 0x2e0   : > { %3167 = vmatpush1.bf16.msra.mxu0 %v3166_v56  ;;  %2166 = vmatprep.mubr.f32.mxu0 %v3419_v3  ;;  %v232_v56 = vld [vmem:[%s4056_s4] sm:$0xff] }
 0x2e1   : > { %2104 = vmatprep.subr.mxu0 %v2013_v15 }
 0x2e4   : > { %2107 = vmatpush1.msra.mxu0 %v2019_v30 }
 0x2e5   : > { %3169 = vmatprep.subr.bf16.mxu0 %v3156_v43 }
 0x2e7   : > { %2169 = vmatmul.mubr.f32.vlgmr.msra.gmra.mrb[2].mxu0 %v1978_v21 }
 0x2e8   : > { %3171 = vmatpush1.bf16.msra.mxu0 %v3906_v49  ;;  %2245 = vmatprep.mubr.f32.mxu0 %v3419_v3 }
 0x2e9   : > { %2184 = vmatprep.subr.mxu0 %v1914_v24 }
 0x2ec   : > { %2186 = vmatpush1.msra.mxu0 %v1916_v40 }
 0x2ed   : > { %3173 = vmatprep.subr.bf16.mxu0 %v3172_v51 }
 0x2ef   : > { %2249 = vmatmul.mubr.f32.vlgmr.msra.gmra.mrb[2].mxu0 %v1979_v48 }
 0x2f0   : > { %3175 = vmatpush1.bf16.msra.mxu0 %v3921_v22  ;;  %2337 = vmatprep.mubr.f32.mxu0 %v3419_v3  ;;  %v2512_v22 = vsel %vm869_vm8, %v232_v56, 0 }
 0x2f1   : > { %2274 = vmatprep.subr.mxu0 %v2014_v47  ;;  %v3961_v6 = vand.u32 4294901760, %v2512_v22 }
 0x2f3   : > { %v3964_v25 = vsub.f32 %v2512_v22, %v3961_v6 }
 0x2f4   : > { %2278 = vmatpush1.msra.mxu0 %v2020_v60 }
 0x2f5   : > { %3177 = vmatprep.subr.bf16.mxu0 %v3156_v43  ;;  %v2585_v14 = vand.u32 4294901760, %v3964_v25 }
 0x2f7   : > { %2339 = vmatmul.mubr.f32.vlgmr.msra.gmra.mrb[2].mxu0 %v3937_v17 }
 0x2f8   : > { %3179 = vmatpush1.bf16.msra.mxu0 %v3906_v49  ;;  %2415 = vmatprep.mubr.f32.mxu0 %v3419_v3 }
 0x2f9   : > { %2354 = vmatprep.subr.mxu0 %v1914_v24 }
 0x2fc   : > { %2356 = vmatpush1.msra.mxu0 %v1916_v40 }
 0x2ff   : > { %2417 = vmatmul.mubr.f32.vlgmr.msra.gmra.mrb[2].mxu0 %v3937_v17 }
 0x300   : > { %2582 = vmatprep.mubr.f32.mxu0 %v3419_v3 }
 0x3aa   : > { %v1983_v4 = vpop.f32.mrb[6].mxu1 }
 0x3ab   : > { %v1985_v12 = vpop.f32.mrb[7].mxu1 }
 0x3d2   : > { %v2418_v61 = vpop.f32.mrb[2].mxu0 }
 0x3d3   : > { %v3204_v49 = vadd.f32 %v2418_v61, %v1983_v4  ;;  %v2420_v9 = vpop.f32.mrb[3].mxu0 }
 0x3d4   : > { %v3205_v54 = vadd.f32 %v2420_v9, %v1985_v12 }
 0x3d5   : > { %v2423_v42 = vmul.f32 %v3204_v49, %v3204_v49  ;;  %v2427_v44 = vrot.slane %v3204_v49, 1  ;;  %v2433_v26 = vrot.slane %v3204_v49, 2  ;;  %v2439_v7 = vrot.slane %v3204_v49, 3 }
 0x3d6   : > { %v2424_v29 = vmul.f32 %v3205_v54, %v3205_v54  ;;  %v2428_v27 = vrot.slane %v3205_v54, 1  ;;  %v2434_v36 = vrot.slane %v3205_v54, 2  ;;  %v2440_v16 = vrot.slane %v3205_v54, 3 }
 0x3d7   : > { %v2431_v57 = vmul.f32 %v3204_v49, %v2427_v44  ;;  %v2437_v31 = vmul.f32 %v3204_v49, %v2433_v26  ;;  %v2443_v28 = vmul.f32 %v3204_v49, %v2439_v7  ;;  %v2447_v18 = vrot.slane %v2423_v42, 4 }
 0x3d8   : > { %v2432_v46 = vmul.f32 %v3205_v54, %v2428_v27  ;;  %v2438_v32 = vmul.f32 %v3205_v54, %v2434_v36  ;;  %v2444_v33 = vmul.f32 %v3205_v54, %v2440_v16  ;;  %v2448_v1 = vrot.slane %v2424_v29, 4 }
 0x3d9   : > { %v2470_v41 = vrot.slane %v2424_v29, 1  ;;  %v2478_v13 = vrot.slane %v2424_v29, 7  ;;  %v2486_v53 = vrot.slane %v2424_v29, 6  ;;  %v2453_v34 = vrot.slane %v2431_v57, 3 }
 0x3da   : > { %v2454_v24 = vrot.slane %v2432_v46, 3  ;;  %v2460_v17 = vrot.slane %v2438_v32, 2  ;;  %v2474_v19 = vrot.slane %v2438_v32, 7  ;;  %v2466_v63 = vrot.slane %v2444_v33, 1 }
 0x3db   : > { %v2482_v21 = vrot.slane %v2432_v46, 6  ;;  %v2490_v38 = vsel %vm300_vm4, %v3205_v54, %v2448_v1  ;;  %v2498_v40 = vsel %vm291_vm1, %v2470_v41, %v2432_v46  ;;  %v2459_v15 = vrot.slane %v2437_v31, 2 }
 0x3dc   : > { %v2492_v62 = vsel %vm303_vm5, %v2490_v38, %v2454_v24  ;;  %v2500_v58 = vsel %vm294_vm2, %v2498_v40, %v2474_v19  ;;  %v2469_v48 = vrot.slane %v2423_v42, 1  ;;  %v2465_v23 = vrot.slane %v2443_v28, 1 }
 0x3dd   : > { %v2494_v43 = vsel %vm306_vm6, %v2492_v62, %v2460_v17  ;;  %v2502_v39 = vsel %vm297_vm3, %v2500_v58, %v2478_v13  ;;  %v2473_v30 = vrot.slane %v2437_v31, 7  ;;  %v2477_v47 = vrot.slane %v2423_v42, 7 }
 0x3de   : > { %v2496_v45 = vsel %vm309_vm7, %v2494_v43, %v2466_v63  ;;  %v2504_v35 = vsel %vm300_vm4, %v2502_v39, %v2482_v21  ;;  %v2481_v10 = vrot.slane %v2431_v57, 6  ;;  %v2489_v52 = vsel %vm300_vm4, %v3204_v49, %v2447_v18 }
 0x3df   : > { %v2506_v50 = vsel %vm303_vm5, %v2504_v35, %v2486_v53  ;;  %v2514_v51 = vand.u32 4294901760, %v2496_v45  ;;  %v2497_v60 = vsel %vm291_vm1, %v2469_v48, %v2431_v57  ;;  %v2485_v37 = vrot.slane %v2423_v42, 6 }
 0x3e0   : > { %v2508_v8 = vsel %vm306_vm6, %v2506_v50, 1.0  ;;  %v2491_v55 = vsel %vm303_vm5, %v2489_v52, %v2453_v34  ;;  %v2499_v59 = vsel %vm294_vm2, %v2497_v60, %v2473_v30  ;;  %v2586_v29 = vsub.f32 %v3964_v25, %v2585_v14 }
 0x3e1   : > { %v2510_v11 = vsel %vm309_vm7, %v2508_v8, 0.0  ;;  %v2595_v5 = vsub.f32 %v2496_v45, %v2514_v51  ;;  %v2493_v20 = vsel %vm306_vm6, %v2491_v55, %v2459_v15  ;;  %v2501_v4 = vsel %vm297_vm3, %v2499_v59, %v2477_v47 }
 0x3e2   : > { %v2518_v12 = vand.u32 4294901760, %v2510_v11  ;;  %v2495_v56 = vsel %vm309_vm7, %v2493_v20, %v2465_v23  ;;  %v2503_v22 = vsel %vm300_vm4, %v2501_v4, %v2481_v10  ;;  %v2587_v32 = vand.u32 4294901760, %v2586_v29 }
 0x3e3   : > { %v2505_v61 = vsel %vm303_vm5, %v2503_v22, %v2485_v37  ;;  %v2516_v49 = vand.u32 4294901760, %v2495_v56  ;;  %v2596_v9 = vand.u32 4294901760, %v2595_v5  ;;  %v3426_v40 = vmov 1966171168  }
 0x3e4   : > { %v3180_v54 = vpack.c.bf16 %v2518_v12, %v2514_v51  ;;  %v2607_v42 = vsub.f32 %v2510_v11, %v2518_v12  ;;  %v2507_v44 = vsel %vm306_vm6, %v2505_v61, 1.0  ;;  %v3009_v62 = vunpack.c.l.s4 %v3426_v40 }
 0x3e5   : > { %v2509_v26 = vsel %vm309_vm7, %v2507_v44, 0.0  ;;  %v2601_v7 = vsub.f32 %v2495_v56, %v2516_v49  ;;  %v2597_v36 = vsub.f32 %v2595_v5, %v2596_v9  ;;  %vm3025_vm1 = vcmp.lt.s32.totalorder %v239_v0, 256 }
 0x3e6   : > { %3181 = vmatprep.subr.bf16.mxu0 %v3180_v54  ;;  %v2520_v27 = vand.u32 4294901760, %v2509_v26  ;;  %v2608_v16 = vand.u32 4294901760, %v2607_v42  ;;  %v3188_v34 = vpack.c.bf16 %v2607_v42, %v2595_v5  ;;  %v3010_v58 = vunpack.c.0.s8 %v3009_v62 }
 0x3e7   : > { %v2602_v57 = vand.u32 4294901760, %v2601_v7  ;;  %v2598_v33 = vand.u32 4294901760, %v2597_v36 }
 0x3e8   : > { %v3182_v31 = vpack.c.bf16 %v2520_v27, %v2516_v49  ;;  %v2613_v28 = vsub.f32 %v2509_v26, %v2520_v27  ;;  %v2609_v46 = vsub.f32 %v2607_v42, %v2608_v16  ;;  %v3196_v21 = vpack.c.bf16 %v2608_v16, %v2596_v9 }
 0x3e9   : > { %v2603_v41 = vsub.f32 %v2601_v7, %v2602_v57 }
 0x3ea   : > { %3183 = vmatpush1.bf16.msra.mxu0 %v3182_v31  ;;  %v2610_v1 = vand.u32 4294901760, %v2609_v46  ;;  %v2614_v13 = vand.u32 4294901760, %v2613_v28  ;;  %v3190_v63 = vpack.c.bf16 %v2613_v28, %v2601_v7 }
 0x3eb   : > { %v2604_v24 = vand.u32 4294901760, %v2603_v41 }
 0x3ec   : > { %v3184_v53 = vpack.c.bf16 %v2610_v1, %v2598_v33  ;;  %v2615_v18 = vsub.f32 %v2613_v28, %v2614_v13  ;;  %v3198_v38 = vpack.c.bf16 %v2614_v13, %v2602_v57 }
 0x3ed   : > { %2588 = vmatmul.mubr.f32.vlgmr.msra.gmra.mrb[4].mxu0 %v2587_v32 }
 0x3ee   : > { %3185 = vmatprep.subr.bf16.mxu0 %v3184_v53  ;;  %v2616_v17 = vand.u32 4294901760, %v2615_v18  ;;  %2678 = vmatprep.mubr.f32.mxu0 %v3419_v3 }
 0x3f0   : > { %v3186_v19 = vpack.c.bf16 %v2616_v17, %v2604_v24 }
 0x3f2   : > { %3187 = vmatpush1.bf16.msra.mxu0 %v3186_v19 }
 0x3f3   : > { %3189 = vmatprep.subr.bf16.mxu0 %v3188_v34 }
 0x3f5   : > { %2680 = vmatmul.mubr.f32.vlgmr.msra.gmra.mrb[4].mxu0 %v3961_v6 }
 0x3f6   : > { %3191 = vmatpush1.bf16.msra.mxu0 %v3190_v63  ;;  %2758 = vmatprep.mubr.f32.mxu0 %v3419_v3 }
 0x3f7   : > { %3193 = vmatprep.subr.bf16.mxu0 %v3180_v54 }
 0x3fd   : > { %2761 = vmatmul.mubr.f32.vlgmr.msra.gmra.mrb[4].mxu0 %v3964_v25  ;;  %v3013_v25 = vsub.s32 %v3010_v58, %v3511_v2 }
 0x3fe   : > { %3195 = vmatpush1.bf16.msra.mxu0 %v3182_v31  ;;  %2835 = vmatprep.mubr.f32.mxu0 %v3419_v3 }
 0x3ff   : > { %3197 = vmatprep.subr.bf16.mxu0 %v3196_v21 }
 0x405   : > { %2839 = vmatmul.mubr.f32.vlgmr.msra.gmra.mrb[4].mxu0 %v2585_v14 }
 0x406   : > { %3199 = vmatpush1.bf16.msra.mxu0 %v3198_v38  ;;  %2921 = vmatprep.mubr.f32.mxu0 %v3419_v3 }
 0x407   : > { %3201 = vmatprep.subr.bf16.mxu0 %v3180_v54 }
 0x40d   : > { %2923 = vmatmul.mubr.f32.vlgmr.msra.gmra.mrb[4].mxu0 %v3961_v6 }
 0x40e   : > { %3203 = vmatpush1.bf16.msra.mxu0 %v3182_v31  ;;  %2997 = vmatprep.mubr.f32.mxu0 %v3419_v3 }
 0x415   : > { %2999 = vmatmul.mubr.f32.vlgmr.msra.gmra.mrb[4].mxu0 %v3961_v6 }
 0x4e8   : > { %v3000_v15 = vpop.f32.mrb[4].mxu0 }
 0x4e9   : > { %v3002_v14 = vpop.f32.mrb[5].mxu0 }
 0x4ea   : > { %v3007_v48 = vcombine.low %v3000_v15, %v3002_v14 }
 0x4ec   : > { %v3014_v43 = vrot.slane %v3007_v48, %v3013_v25 }
 0x4ee   : > { %v3021_v3 = vrot.slane %v3014_v43, %v3013_v25 }
 0x4f0   : > { %3027 = vst.msk [vmem:[%s218_s9] sm:$0x3] %vm3025_vm1, %v3021_v3 }
 0x4f1   : > { %3368 = shalt.err (!%p3365_p3)
}
 0x4f2   : > { %s3369_s23 = scalar_lea.hbm %s4010_s13, 32  ;;  %s3373_s30 = scalar_lea.hbm %s4057_s5, 64 }
 0x4f3   : > { %p3370_p4 = scmp.ne.s32.totalorder %s4010_s13, %s3369_s23  ;;  %p3374_p9 = scmp.lt.u32.totalorder %s4010_s13, %s4057_s5 }
 0x4f4   : > { %p3375_p10 = scmp.lt.u32.totalorder %s3373_s30, %s3369_s23  ;;  %p3377_p12 = scmp.lt.u32.totalorder %s3369_s23, %s4010_s13 }
 0x4f5   : > { %p3371_p7 = pnand %p3370_p4, %p3496_p5 }
 0x4f6   : > { %p3376_p11 = por %p3375_p10, %p3374_p9 }
 0x4f7   : > { %p3372_p8 = pneg %p3371_p7 }
 0x4f8   : > { %p3378_p13 = por %p3377_p12, %p3376_p11 }
 0x4fa   : > { %p3379_p0 = pnand %p3378_p13, %p3372_p8 }
 0x4fc   : > { %3382 = shalt.err (!%p3379_p0)
}
 0x4fd   : > { %3280 = dma.vmem_to_hbm [thread:$0]  (%p3496_p5), %s4012_s10, 32, %s4010_s13, %s3029_s14  }
 0x4fe PF: > { %p3286_p1 = scmp.ge.s32.totalorder %s3417_s21, 2  ;;  %s3055_s8 = sand.u32 1, %s3405_s18  }
 0x4ff   : > { %s3056_s9 = scalar_lea.sflag [#allocation3], %s3055_s8 }
 0x500   : > { %p3283_p2 = pnand %p3286_p1, %p3500_p6 }
 0x502   : > { %3400 = dma.done.wait (!%p3283_p2), %s3056_s9, 32  }
 0x503   : > { %3402 = vsyncadd (!%p3283_p2), %s3056_s9, 4294967264  ;;  %p15_p3 = scmp.ge.s32.totalorder %s3483_s24, 4   ;;  %s4068_s18 = smov %s3409_s19 }
 0x504   : > { %s4069_s19 = smov %s3413_s20  ;;  %s4070_s20 = smov %s3494_s27 }
 0x505   : > { %s4071_s21 = smov %s3483_s24  ;;  %17 = sbr.rel (!%p15_p3) target bundleno = 3 (0x3), region = 75 }
 0x50c   :  { %3061 = vsyncpa [#allocation3], 1 }
 0x50d   :  { %3063 = vsyncpa [#allocation3 + $0x1], 1 }

</bundles_post_ra>
